<compile_context>
chip_gen: v7x
topology: tpu7x:2x2x1
jax: 0.10.0
libtpu: 0.0.40
codegen_flags: <defaults>
</compile_context>

<pallas_src>
import numpy as np
import jax
import jax.numpy as jnp
from jax import lax
from jax.experimental import pallas as pl
from jax.experimental.pallas import tpu as pltpu

# ----------------------------- small config ---------------------------------
B        = 2            # input batch
B_TILE   = 1            # batch elements per grid tile (set ~ceil(B/num_TCs) at scale)
C_IN     = 3
IMG      = 32
PATCH    = 8
N_PATCH  = (IMG // PATCH) ** 2          # 16
T        = N_PATCH + 1                  # 17 tokens == pos_embed.size(1)
T_PAD    = 24                           # tokens padded to a multiple of 8 sublanes
D        = 64                           # embed dim (768 in the real model)
HEADS    = 4
DH       = D // HEADS
DEPTH    = 2
MLP_HID  = 4 * D
CONV_OUT = 4                            # module's "batch_size" (Conv1d out_channels)
OUT_DIM  = 16                           # module's output_dim (128 in real model)
CONV_K, CONV_S = 3, 2
L_CONV   = (D - CONV_K) // CONV_S + 1   # 31   (383 in real model)
POOL_K   = 3
L_POOL   = L_CONV - POOL_K + 1          # 29   (381 in real model -> nn.Linear(381, out))
PDIM     = C_IN * PATCH * PATCH         # 192
LN_EPS   = 1e-6

assert T > CONV_OUT                     # mirrors: size_input_channels > batch_size
assert T_PAD % 8 == 0 and T_PAD >= T
assert B % B_TILE == 0


# ------------------------------- fused kernel --------------------------------
def _fused_vit_kernel(
    patches_ref, pw_ref, tokadd_ref, small_ref,
    wqkv_ref, wproj_ref, w1_ref, w2_ref,
    lnf_ref, convw_ref, sellin_ref, headb_ref,
    out_ref, x_scr,
):
    f32, bf16 = jnp.float32, jnp.bfloat16
    d = pl.program_id(1)

    def layernorm(x, g, b):
        mu = jnp.mean(x, axis=-1, keepdims=True)
        var = jnp.mean(jnp.square(x - mu), axis=-1, keepdims=True)
        return (x - mu) * lax.rsqrt(var + LN_EPS) * g + b

    # ---- layer-0 init: patch embed (cls / pos / patch bias folded in tokadd) ----
    @pl.when(d == 0)
    def _():
        for b in range(B_TILE):
            x_scr[b] = (jnp.dot(patches_ref[b], pw_ref[...],
                                preferred_element_type=f32)
                        + tokadd_ref[...])                      # (T_PAD, D) f32

    # additive key-padding mask, hoisted out of the head/batch loops
    kbias = jnp.where(
        lax.broadcasted_iota(jnp.int32, (1, T_PAD), 1) < T, 0.0, -1e30
    ).astype(f32)

    # per-layer params (streamed for layer `d` by the BlockSpecs)
    small = small_ref[0]                  # (8, MLP_HID) f32
    ln1g  = small[0:1, 0:D]
    ln1b  = small[1:2, 0:D]
    bqkv  = small[2:3, 0:3 * D]           # already scaled on the q-part
    bproj = small[3:4, 0:D]
    ln2g  = small[4:5, 0:D]
    ln2b  = small[5:6, 0:D]
    b1    = small[6:7, :]
    b2    = small[7:8, 0:D]
    wqkv  = wqkv_ref[0]                   # (D, 3D) bf16, q-columns pre-scaled
    wproj = wproj_ref[0]                  # (D, D)  bf16
    w1    = w1_ref[0]                     # (D, MLP_HID) bf16
    w2    = w2_ref[0]                     # (MLP_HID, D) bf16

    # ---- one pre-LN transformer block (this grid step == layer d) ----
    for b in range(B_TILE):
        x = x_scr[b]                                              # (T_PAD, D) f32

        # attention sublayer
        h = layernorm(x, ln1g, ln1b)
        qkv = (jnp.dot(h.astype(bf16), wqkv,
                       preferred_element_type=f32) + bqkv)        # (T_PAD, 3D) f32
        heads = []
        for hh in range(HEADS):                                   # static unroll
            q = qkv[:, hh * DH:(hh + 1) * DH]
            k = qkv[:, D + hh * DH:D + (hh + 1) * DH]
            v = qkv[:, 2 * D + hh * DH:2 * D + (hh + 1) * DH]
            s = lax.dot_general(q.astype(bf16), k.astype(bf16),
                                (((1,), (1,)), ((), ())),
                                preferred_element_type=f32) + kbias
            m = jnp.max(s, axis=-1, keepdims=True)
            p = jnp.exp(s - m)
            p = p * pl.reciprocal(jnp.sum(p, axis=-1, keepdims=True), approx=True)
            heads.append(jnp.dot(p.astype(bf16), v.astype(bf16),
                                 preferred_element_type=f32))     # (T_PAD, DH)
        attn = jnp.concatenate(heads, axis=-1)                    # (T_PAD, D)
        x = x + jnp.dot(attn.astype(bf16), wproj,
                        preferred_element_type=f32) + bproj

        # MLP sublayer
        h2 = layernorm(x, ln2g, ln2b)
        hid = jnp.dot(h2.astype(bf16), w1, preferred_element_type=f32) + b1
        # TODO(synk): timm's nn.GELU is erf-exact; tanh-approx GELU used here.
        hid = jax.nn.gelu(hid, approximate=True)
        x = x + jnp.dot(hid.astype(bf16), w2, preferred_element_type=f32) + b2

        x_scr[b] = x

    # ---- final LN + fused Conv1d / AvgPool / Dropout(id) / Linear tail ----
    @pl.when(d == DEPTH - 1)
    def _():
        lnfg = lnf_ref[0:1, :]
        lnfb = lnf_ref[1:2, :]
        for b in range(B_TILE):
            emb = layernorm(x_scr[b], lnfg, lnfb).astype(bf16)    # (T_PAD, D)
            acc = headb_ref[...]                                  # (CONV_OUT, OUT_DIM) f32
            for k in range(CONV_K):
                g = jnp.dot(convw_ref[k], emb,
                            preferred_element_type=f32)           # (CONV_OUT, D)
                acc = acc + jnp.dot(g.astype(bf16), sellin_ref[k],
                                    preferred_element_type=f32)   # (CONV_OUT, OUT_DIM)
            out_ref[b] = acc


def _fused_call(patches_pad, packed):
    Bx = patches_pad.shape[0]
    b_tiles = Bx // B_TILE

    def const_spec(a):
        nd = a.ndim
        return pl.BlockSpec(tuple(a.shape), lambda bt, d, _nd=nd: (0,) * _nd)

    def depth_spec(a):
        # (DEPTH, r, c) stacked weights: stream one layer per depth grid step.
        return pl.BlockSpec((1,) + tuple(a.shape[1:]), lambda bt, d: (d, 0, 0))

    (pw, tokadd, small, wqkv, wproj, w1, w2, lnf, convw, sellin, headb) = packed

    in_specs = [
        pl.BlockSpec((B_TILE, T_PAD, PDIM), lambda bt, d: (bt, 0, 0)),
        const_spec(pw), const_spec(tokadd),
        depth_spec(small), depth_spec(wqkv), depth_spec(wproj),
        depth_spec(w1), depth_spec(w2),
        const_spec(lnf), const_spec(convw), const_spec(sellin), const_spec(headb),
    ]

    return pl.pallas_call(
        _fused_vit_kernel,
        out_shape=jax.ShapeDtypeStruct((Bx, CONV_OUT, OUT_DIM), jnp.float32),
        grid=(b_tiles, DEPTH),
        in_specs=in_specs,
        out_specs=pl.BlockSpec((B_TILE, CONV_OUT, OUT_DIM), lambda bt, d: (bt, 0, 0)),
        scratch_shapes=[pltpu.VMEM((B_TILE, T_PAD, D), jnp.float32)],
        compiler_params=pltpu.CompilerParams(
            # batch tiles split across TensorCores; depth axis is a carried loop.
            dimension_semantics=("parallel", "arbitrary"),
            # explicit VMEM budget (fits all of v5e/v6e/v7x at this size; raise
            # per-generation when scaling to D=768 / DEPTH=12 bf16 layer blocks).
            vmem_limit_bytes=32 * 1024 * 1024),
    )(patches_pad, *packed)


# --------------------------- parameter init ---------------------------------
def init_params(key):
    keys = iter(jax.random.split(key, 32))

    def nrm(shape, scale=0.02):
        return scale * jax.random.normal(next(keys), shape, dtype=jnp.float32)

    params = {
        "patch_w": nrm((PDIM, D)),
        "patch_b": nrm((D,)),
        "cls":     nrm((D,)),
        "pos":     nrm((T, D)),
        "blocks":  [],
        "lnf_g":   jnp.ones((D,), jnp.float32),
        "lnf_b":   jnp.zeros((D,), jnp.float32),
        "conv_w":  nrm((CONV_OUT, T, CONV_K)),   # torch Conv1d weight (Cout, Cin, K)
        "conv_b":  nrm((CONV_OUT,)),
        "lin_w":   nrm((L_POOL, OUT_DIM)),       # torch Linear weight, transposed
        "lin_b":   nrm((OUT_DIM,)),
    }
    for _ in range(DEPTH):
        params["blocks"].append({
            "ln1_g": jnp.ones((D,), jnp.float32), "ln1_b": jnp.zeros((D,), jnp.float32),
            "wqkv":  nrm((D, 3 * D)),             "bqkv":  nrm((3 * D,)),
            "wproj": nrm((D, D)),                 "bproj": nrm((D,)),
            "ln2_g": jnp.ones((D,), jnp.float32), "ln2_b": jnp.zeros((D,), jnp.float32),
            "w1":    nrm((D, MLP_HID)),           "b1":    nrm((MLP_HID,)),
            "w2":    nrm((MLP_HID, D)),           "b2":    nrm((D,)),
        })
    return params


def pack_params(p):
    """One-time repack into kernel-ready arrays (bf16 matmul weights, folded constants)."""
    f32, bf16 = jnp.float32, jnp.bfloat16
    blks = p["blocks"]
    stk = lambda n: jnp.stack([b[n] for b in blks], axis=0)
    scale = DH ** -0.5

    # attention 1/sqrt(DH) folded into Wq / bq at pack time (free)
    wqkv = stk("wqkv").at[:, :, 0:D].multiply(scale).astype(bf16)   # (DEPTH, D, 3D)
    bqkv = stk("bqkv").at[:, 0:D].multiply(scale)                   # (DEPTH, 3D)

    # per-layer small vectors coalesced into one lane-aligned slab (one DMA / layer)
    small = jnp.zeros((DEPTH, 8, MLP_HID), f32)
    small = small.at[:, 0, 0:D].set(stk("ln1_g"))
    small = small.at[:, 1, 0:D].set(stk("ln1_b"))
    small = small.at[:, 2, 0:3 * D].set(bqkv)
    small = small.at[:, 3, 0:D].set(stk("bproj"))
    small = small.at[:, 4, 0:D].set(stk("ln2_g"))
    small = small.at[:, 5, 0:D].set(stk("ln2_b"))
    small = small.at[:, 6, :].set(stk("b1"))
    small = small.at[:, 7, 0:D].set(stk("b2"))

    wproj = stk("wproj").astype(bf16)                               # (DEPTH, D, D)
    w1 = stk("w1").astype(bf16)                                     # (DEPTH, D, MLP_HID)
    w2 = stk("w2").astype(bf16)                                     # (DEPTH, MLP_HID, D)

    # tokadd: row 0 = cls + pos[0]; rows 1..T-1 = patch_b + pos[1:]; pad rows = 0
    tokadd = jnp.concatenate([
        (p["cls"] + p["pos"][0]).reshape(1, D),
        p["pos"][1:T] + p["patch_b"].reshape(1, D),
        jnp.zeros((T_PAD - T, D), f32),
    ], axis=0)                                                      # (T_PAD, D)

    lnf = jnp.stack([p["lnf_g"], p["lnf_b"]], axis=0)               # (2, D)

    # Conv1d weight: (Cout, T, K) -> (K, Cout, T_PAD); padded token columns = 0.
    convw = jnp.transpose(p["conv_w"], (2, 0, 1))
    convw = jnp.pad(convw, ((0, 0), (0, 0), (0, T_PAD - T))).astype(bf16)

    # Fold strided selection + AvgPool1d(3,1) + Linear weight offline:
    #   sel[k][d, l] = 1 iff d == CONV_S*l + k ;  pool[l, q] = 1/3 iff q <= l <= q+2
    #   sel_lin[k] = sel[k] @ pool @ lin_w   with shape (D, OUT_DIM)
    sel_np = np.zeros((CONV_K, D, L_CONV), np.float32)
    for k in range(CONV_K):
        for l in range(L_CONV):
            sel_np[k, CONV_S * l + k, l] = 1.0
    pool_np = np.zeros((L_CONV, L_POOL), np.float32)
    for l in range(L_CONV):
        for q in range(L_POOL):
            if q <= l <= q + POOL_K - 1:
                pool_np[l, q] = 1.0 / POOL_K
    pool_lin = jnp.asarray(pool_np) @ p["lin_w"]                    # (L_CONV, OUT_DIM)
    sel_lin = jnp.einsum("kdl,lo->kdo",
                         jnp.asarray(sel_np), pool_lin).astype(bf16)  # (K, D, OUT_DIM)

    # Conv1d bias folded exactly through AvgPool (constant per row) and Linear.
    headb = (p["lin_b"].reshape(1, OUT_DIM)
             + p["conv_b"].reshape(CONV_OUT, 1)
             * jnp.sum(p["lin_w"], axis=0, keepdims=True))          # (CONV_OUT, OUT_DIM)

    return (p["patch_w"].astype(bf16), tokadd, small, wqkv, wproj, w1, w2,
            lnf, convw, sel_lin, headb)


# ------------------------------ forward pass ---------------------------------
def vit_encoder_forward(x_nchw, packed):
    Bx = x_nchw.shape[0]
    nh = IMG // PATCH
    # im2col for the patch-embed Conv2d(kernel=stride=PATCH) — pure data movement.
    patches = x_nchw.reshape(Bx, C_IN, nh, PATCH, nh, PATCH)
    patches = patches.transpose(0, 2, 4, 1, 3, 5).reshape(Bx, N_PATCH, PDIM)
    # Row 0 (cls slot) and rows T..T_PAD-1 are zero; the kernel's tokadd makes
    # the padding numerically exact.  bf16 operands for the MXU patch-embed matmul.
    patches_pad = jnp.pad(patches, ((0, 0), (1, T_PAD - 1 - N_PATCH), (0, 0)))
    return _fused_call(patches_pad.astype(jnp.bfloat16), packed)


# ---------------------------------- main -------------------------------------
if __name__ == "__main__":
    key = jax.random.PRNGKey(0)
    pkey, xkey = jax.random.split(key)
    params = init_params(pkey)
    packed = pack_params(params)

    x = jax.random.normal(xkey, (B, C_IN, IMG, IMG), dtype=jnp.float32)

    fwd = jax.jit(lambda v: vit_encoder_forward(v, packed))
    out = fwd(x)
    jax.block_until_ready(out)
    assert out.shape == (B, CONV_OUT, OUT_DIM), out.shape
    assert bool(jnp.all(jnp.isfinite(out)))
    print("KERNEL_OK")
</pallas_src>

<mosaic_0001>
module attributes {stable_mosaic.version = 11 : i64} {
  func.func @_fused_vit_kernel(%arg0: i32, %arg1: i32, %arg2: memref<1x24x192xbf16, #tpu.memory_space<vmem>>, %arg3: memref<192x64xbf16, #tpu.memory_space<vmem>>, %arg4: memref<24x64xf32, #tpu.memory_space<vmem>>, %arg5: memref<1x8x256xf32, #tpu.memory_space<vmem>>, %arg6: memref<1x64x192xbf16, #tpu.memory_space<vmem>>, %arg7: memref<1x64x64xbf16, #tpu.memory_space<vmem>>, %arg8: memref<1x64x256xbf16, #tpu.memory_space<vmem>>, %arg9: memref<1x256x64xbf16, #tpu.memory_space<vmem>>, %arg10: memref<2x64xf32, #tpu.memory_space<vmem>>, %arg11: memref<3x4x24xbf16, #tpu.memory_space<vmem>>, %arg12: memref<3x64x16xbf16, #tpu.memory_space<vmem>>, %arg13: memref<4x16xf32, #tpu.memory_space<vmem>>, %arg14: memref<1x4x16xf32, #tpu.memory_space<vmem>>, %arg15: memref<1x24x64xf32, #tpu.memory_space<vmem>>) attributes {dimension_semantics = [#tpu.dimension_semantics<parallel>, #tpu.dimension_semantics<arbitrary>], iteration_bounds = array<i64: 2, 2>, scalar_prefetch = 0 : i64, scratch_operands = 1 : i64, tpu.core_type = #tpu.core_type<tc>, window_params = [{transform_indices = @transform_0, window_bounds = array<i64: 1, 24, 192>}, {pipeline_mode = #tpu.pipeline_mode<synchronous>, transform_indices = @transform_1, window_bounds = array<i64: 192, 64>}, {pipeline_mode = #tpu.pipeline_mode<synchronous>, transform_indices = @transform_2, window_bounds = array<i64: 24, 64>}, {transform_indices = @transform_3, window_bounds = array<i64: 1, 8, 256>}, {transform_indices = @transform_4, window_bounds = array<i64: 1, 64, 192>}, {transform_indices = @transform_5, window_bounds = array<i64: 1, 64, 64>}, {transform_indices = @transform_6, window_bounds = array<i64: 1, 64, 256>}, {transform_indices = @transform_7, window_bounds = array<i64: 1, 256, 64>}, {pipeline_mode = #tpu.pipeline_mode<synchronous>, transform_indices = @transform_8, window_bounds = array<i64: 2, 64>}, {pipeline_mode = #tpu.pipeline_mode<synchronous>, transform_indices = @transform_9, window_bounds = array<i64: 3, 4, 24>}, {pipeline_mode = #tpu.pipeline_mode<synchronous>, transform_indices = @transform_10, window_bounds = array<i64: 3, 64, 16>}, {pipeline_mode = #tpu.pipeline_mode<synchronous>, transform_indices = @transform_11, window_bounds = array<i64: 4, 16>}, {transform_indices = @transform_12, window_bounds = array<i64: 1, 4, 16>}]} {
    %c0_i32 = arith.constant 0 : i32
    %0 = arith.cmpi eq, %arg1, %c0_i32 : i32
    %1 = arith.extui %0 : i1 to i32
    %c0_i32_0 = arith.constant 0 : i32
    %2 = arith.cmpi ne, %1, %c0_i32_0 : i32
    scf.if %2 {
      %c0_57 = arith.constant 0 : index
      %c0_58 = arith.constant 0 : index
      %c0_59 = arith.constant 0 : index
      %195 = vector.load %arg2[%c0_57, %c0_58, %c0_59] : memref<1x24x192xbf16, #tpu.memory_space<vmem>>, vector<1x24x192xbf16>
      %196 = vector.shape_cast %195 : vector<1x24x192xbf16> to vector<24x192xbf16>
      %c0_60 = arith.constant 0 : index
      %c0_61 = arith.constant 0 : index
      %197 = vector.load %arg3[%c0_60, %c0_61] : memref<192x64xbf16, #tpu.memory_space<vmem>>, vector<192x64xbf16>
      %cst_62 = arith.constant dense<0.000000e+00> : vector<24x64xf32>
      %198 = tpu.matmul %196, %197, %cst_62 {dimension_numbers = #tpu.dot_dimension_numbers<[1], [0], [0], [1], [0, 0, 1, 1], [], []>} : vector<24x192xbf16>, vector<192x64xbf16>, vector<24x64xf32> -> vector<24x64xf32>
      %c0_63 = arith.constant 0 : index
      %c0_64 = arith.constant 0 : index
      %199 = vector.load %arg4[%c0_63, %c0_64] : memref<24x64xf32, #tpu.memory_space<vmem>>, vector<24x64xf32>
      %200 = arith.addf %198, %199 : vector<24x64xf32>
      %c0_65 = arith.constant 0 : index
      %c0_66 = arith.constant 0 : index
      %c0_67 = arith.constant 0 : index
      %201 = vector.load %arg15[%c0_65, %c0_66, %c0_67] : memref<1x24x64xf32, #tpu.memory_space<vmem>>, vector<1x24x64xf32>
      %202 = vector.shape_cast %201 : vector<1x24x64xf32> to vector<24x64xf32>
      %203 = vector.shape_cast %200 : vector<24x64xf32> to vector<1x24x64xf32>
      tpu.vector_store %arg15[%c0_65, %c0_66, %c0_67], %203 {strides = array<i32>} : memref<1x24x64xf32, #tpu.memory_space<vmem>>, vector<1x24x64xf32>,
    } else {
    }
    %3 = tpu.iota {dimensions = array<i32: 1>} : vector<1x24xi32>
    %c17_i32 = arith.constant 17 : i32
    %4 = vector.broadcast %c17_i32 : i32 to vector<1x24xi32>
    %5 = arith.cmpi slt, %3, %4 : vector<1x24xi32>
    %cst = arith.constant 0.000000e+00 : f32
    %cst_1 = arith.constant -1.000000e+30 : f32
    %6 = vector.broadcast %cst : f32 to vector<1x24xf32>
    %7 = vector.broadcast %cst_1 : f32 to vector<1x24xf32>
    %8 = arith.select %5, %6, %7 : vector<1x24xi1>, vector<1x24xf32>
    %c0 = arith.constant 0 : index
    %c0_2 = arith.constant 0 : index
    %c0_3 = arith.constant 0 : index
    %9 = vector.load %arg5[%c0, %c0_2, %c0_3] : memref<1x8x256xf32, #tpu.memory_space<vmem>>, vector<1x8x256xf32>
    %10 = vector.shape_cast %9 : vector<1x8x256xf32> to vector<8x256xf32>
    %11 = vector.extract_strided_slice %10 {offsets = [0, 0], sizes = [1, 64], strides = [1, 1]} : vector<8x256xf32> to vector<1x64xf32>
    %12 = vector.extract_strided_slice %10 {offsets = [1, 0], sizes = [1, 64], strides = [1, 1]} : vector<8x256xf32> to vector<1x64xf32>
    %13 = vector.extract_strided_slice %10 {offsets = [2, 0], sizes = [1, 192], strides = [1, 1]} : vector<8x256xf32> to vector<1x192xf32>
    %14 = vector.extract_strided_slice %10 {offsets = [3, 0], sizes = [1, 64], strides = [1, 1]} : vector<8x256xf32> to vector<1x64xf32>
    %15 = vector.extract_strided_slice %10 {offsets = [4, 0], sizes = [1, 64], strides = [1, 1]} : vector<8x256xf32> to vector<1x64xf32>
    %16 = vector.extract_strided_slice %10 {offsets = [5, 0], sizes = [1, 64], strides = [1, 1]} : vector<8x256xf32> to vector<1x64xf32>
    %17 = vector.extract_strided_slice %10 {offsets = [6, 0], sizes = [1, 256], strides = [1, 1]} : vector<8x256xf32> to vector<1x256xf32>
    %18 = vector.extract_strided_slice %10 {offsets = [7, 0], sizes = [1, 64], strides = [1, 1]} : vector<8x256xf32> to vector<1x64xf32>
    %c0_4 = arith.constant 0 : index
    %c0_5 = arith.constant 0 : index
    %c0_6 = arith.constant 0 : index
    %19 = vector.load %arg6[%c0_4, %c0_5, %c0_6] : memref<1x64x192xbf16, #tpu.memory_space<vmem>>, vector<1x64x192xbf16>
    %20 = vector.shape_cast %19 : vector<1x64x192xbf16> to vector<64x192xbf16>
    %c0_7 = arith.constant 0 : index
    %c0_8 = arith.constant 0 : index
    %c0_9 = arith.constant 0 : index
    %21 = vector.load %arg7[%c0_7, %c0_8, %c0_9] : memref<1x64x64xbf16, #tpu.memory_space<vmem>>, vector<1x64x64xbf16>
    %22 = vector.shape_cast %21 : vector<1x64x64xbf16> to vector<64x64xbf16>
    %c0_10 = arith.constant 0 : index
    %c0_11 = arith.constant 0 : index
    %c0_12 = arith.constant 0 : index
    %23 = vector.load %arg8[%c0_10, %c0_11, %c0_12] : memref<1x64x256xbf16, #tpu.memory_space<vmem>>, vector<1x64x256xbf16>
    %24 = vector.shape_cast %23 : vector<1x64x256xbf16> to vector<64x256xbf16>
    %c0_13 = arith.constant 0 : index
    %c0_14 = arith.constant 0 : index
    %c0_15 = arith.constant 0 : index
    %25 = vector.load %arg9[%c0_13, %c0_14, %c0_15] : memref<1x256x64xbf16, #tpu.memory_space<vmem>>, vector<1x256x64xbf16>
    %26 = vector.shape_cast %25 : vector<1x256x64xbf16> to vector<256x64xbf16>
    %c0_16 = arith.constant 0 : index
    %c0_17 = arith.constant 0 : index
    %c0_18 = arith.constant 0 : index
    %27 = vector.load %arg15[%c0_16, %c0_17, %c0_18] : memref<1x24x64xf32, #tpu.memory_space<vmem>>, vector<1x24x64xf32>
    %28 = vector.shape_cast %27 : vector<1x24x64xf32> to vector<24x64xf32>
    %cst_19 = arith.constant dense<0.000000e+00> : vector<24xf32>
    %29 = vector.multi_reduction <add>, %28, %cst_19 [1] : vector<24x64xf32> to vector<24xf32>
    %30 = vector.shape_cast %29 : vector<24xf32> to vector<24x1xf32>
    %cst_20 = arith.constant 6.400000e+01 : f32
    %31 = vector.broadcast %cst_20 : f32 to vector<24x1xf32>
    %32 = arith.divf %30, %31 : vector<24x1xf32>
    %33 = vector.broadcast %32 : vector<24x1xf32> to vector<24x64xf32>
    %34 = arith.subf %28, %33 : vector<24x64xf32>
    %35 = arith.mulf %34, %34 : vector<24x64xf32>
    %cst_21 = arith.constant dense<0.000000e+00> : vector<24xf32>
    %36 = vector.multi_reduction <add>, %35, %cst_21 [1] : vector<24x64xf32> to vector<24xf32>
    %37 = vector.shape_cast %36 : vector<24xf32> to vector<24x1xf32>
    %cst_22 = arith.constant 6.400000e+01 : f32
    %38 = vector.broadcast %cst_22 : f32 to vector<24x1xf32>
    %39 = arith.divf %37, %38 : vector<24x1xf32>
    %40 = vector.broadcast %32 : vector<24x1xf32> to vector<24x64xf32>
    %41 = arith.subf %28, %40 : vector<24x64xf32>
    %cst_23 = arith.constant 9.99999997E-7 : f32
    %42 = vector.broadcast %cst_23 : f32 to vector<24x1xf32>
    %43 = arith.addf %39, %42 : vector<24x1xf32>
    %44 = math.rsqrt %43 : vector<24x1xf32>
    %45 = vector.broadcast %44 : vector<24x1xf32> to vector<24x64xf32>
    %46 = arith.mulf %41, %45 : vector<24x64xf32>
    %47 = vector.broadcast %11 : vector<1x64xf32> to vector<24x64xf32>
    %48 = arith.mulf %46, %47 : vector<24x64xf32>
    %49 = vector.broadcast %12 : vector<1x64xf32> to vector<24x64xf32>
    %50 = arith.addf %48, %49 : vector<24x64xf32>
    %51 = arith.truncf %50 : vector<24x64xf32> to vector<24x64xbf16>
    %cst_24 = arith.constant dense<0.000000e+00> : vector<24x192xf32>
    %52 = tpu.matmul %51, %20, %cst_24 {dimension_numbers = #tpu.dot_dimension_numbers<[1], [0], [0], [1], [0, 0, 1, 1], [], []>} : vector<24x64xbf16>, vector<64x192xbf16>, vector<24x192xf32> -> vector<24x192xf32>
    %53 = vector.broadcast %13 : vector<1x192xf32> to vector<24x192xf32>
    %54 = arith.addf %52, %53 : vector<24x192xf32>
    %55 = vector.extract_strided_slice %54 {offsets = [0, 0], sizes = [24, 16], strides = [1, 1]} : vector<24x192xf32> to vector<24x16xf32>
    %56 = vector.extract_strided_slice %54 {offsets = [0, 64], sizes = [24, 16], strides = [1, 1]} : vector<24x192xf32> to vector<24x16xf32>
    %57 = vector.extract_strided_slice %54 {offsets = [0, 128], sizes = [24, 16], strides = [1, 1]} : vector<24x192xf32> to vector<24x16xf32>
    %58 = arith.truncf %55 : vector<24x16xf32> to vector<24x16xbf16>
    %59 = arith.truncf %56 : vector<24x16xf32> to vector<24x16xbf16>
    %cst_25 = arith.constant dense<0.000000e+00> : vector<24x24xf32>
    %60 = tpu.matmul %58, %59, %cst_25 {dimension_numbers = #tpu.dot_dimension_numbers<[1], [1], [0], [0], [0, 0, 1, 0], [], []>} : vector<24x16xbf16>, vector<24x16xbf16>, vector<24x24xf32> -> vector<24x24xf32>
    %61 = vector.broadcast %8 : vector<1x24xf32> to vector<24x24xf32>
    %62 = arith.addf %60, %61 : vector<24x24xf32>
    %cst_26 = arith.constant dense<0xFF800000> : vector<24xf32>
    %63 = vector.multi_reduction <maximumf>, %62, %cst_26 [1] : vector<24x24xf32> to vector<24xf32>
    %64 = vector.shape_cast %63 : vector<24xf32> to vector<24x1xf32>
    %65 = vector.broadcast %64 : vector<24x1xf32> to vector<24x24xf32>
    %66 = arith.subf %62, %65 : vector<24x24xf32>
    %67 = math.exp %66 : vector<24x24xf32>
    %cst_27 = arith.constant dense<0.000000e+00> : vector<24xf32>
    %68 = vector.multi_reduction <add>, %67, %cst_27 [1] : vector<24x24xf32> to vector<24xf32>
    %69 = vector.shape_cast %68 : vector<24xf32> to vector<24x1xf32>
    %70 = tpu.reciprocal %69 {approx = true} : vector<24x1xf32> -> vector<24x1xf32>
    %71 = vector.broadcast %70 : vector<24x1xf32> to vector<24x24xf32>
    %72 = arith.mulf %67, %71 : vector<24x24xf32>
    %73 = arith.truncf %72 : vector<24x24xf32> to vector<24x24xbf16>
    %74 = arith.truncf %57 : vector<24x16xf32> to vector<24x16xbf16>
    %cst_28 = arith.constant dense<0.000000e+00> : vector<24x16xf32>
    %75 = tpu.matmul %73, %74, %cst_28 {dimension_numbers = #tpu.dot_dimension_numbers<[1], [0], [0], [1], [0, 0, 1, 1], [], []>} : vector<24x24xbf16>, vector<24x16xbf16>, vector<24x16xf32> -> vector<24x16xf32>
    %76 = vector.extract_strided_slice %54 {offsets = [0, 16], sizes = [24, 16], strides = [1, 1]} : vector<24x192xf32> to vector<24x16xf32>
    %77 = vector.extract_strided_slice %54 {offsets = [0, 80], sizes = [24, 16], strides = [1, 1]} : vector<24x192xf32> to vector<24x16xf32>
    %78 = vector.extract_strided_slice %54 {offsets = [0, 144], sizes = [24, 16], strides = [1, 1]} : vector<24x192xf32> to vector<24x16xf32>
    %79 = arith.truncf %76 : vector<24x16xf32> to vector<24x16xbf16>
    %80 = arith.truncf %77 : vector<24x16xf32> to vector<24x16xbf16>
    %cst_29 = arith.constant dense<0.000000e+00> : vector<24x24xf32>
    %81 = tpu.matmul %79, %80, %cst_29 {dimension_numbers = #tpu.dot_dimension_numbers<[1], [1], [0], [0], [0, 0, 1, 0], [], []>} : vector<24x16xbf16>, vector<24x16xbf16>, vector<24x24xf32> -> vector<24x24xf32>
    %82 = vector.broadcast %8 : vector<1x24xf32> to vector<24x24xf32>
    %83 = arith.addf %81, %82 : vector<24x24xf32>
    %cst_30 = arith.constant dense<0xFF800000> : vector<24xf32>
    %84 = vector.multi_reduction <maximumf>, %83, %cst_30 [1] : vector<24x24xf32> to vector<24xf32>
    %85 = vector.shape_cast %84 : vector<24xf32> to vector<24x1xf32>
    %86 = vector.broadcast %85 : vector<24x1xf32> to vector<24x24xf32>
    %87 = arith.subf %83, %86 : vector<24x24xf32>
    %88 = math.exp %87 : vector<24x24xf32>
    %cst_31 = arith.constant dense<0.000000e+00> : vector<24xf32>
    %89 = vector.multi_reduction <add>, %88, %cst_31 [1] : vector<24x24xf32> to vector<24xf32>
    %90 = vector.shape_cast %89 : vector<24xf32> to vector<24x1xf32>
    %91 = tpu.reciprocal %90 {approx = true} : vector<24x1xf32> -> vector<24x1xf32>
    %92 = vector.broadcast %91 : vector<24x1xf32> to vector<24x24xf32>
    %93 = arith.mulf %88, %92 : vector<24x24xf32>
    %94 = arith.truncf %93 : vector<24x24xf32> to vector<24x24xbf16>
    %95 = arith.truncf %78 : vector<24x16xf32> to vector<24x16xbf16>
    %cst_32 = arith.constant dense<0.000000e+00> : vector<24x16xf32>
    %96 = tpu.matmul %94, %95, %cst_32 {dimension_numbers = #tpu.dot_dimension_numbers<[1], [0], [0], [1], [0, 0, 1, 1], [], []>} : vector<24x24xbf16>, vector<24x16xbf16>, vector<24x16xf32> -> vector<24x16xf32>
    %97 = vector.extract_strided_slice %54 {offsets = [0, 32], sizes = [24, 16], strides = [1, 1]} : vector<24x192xf32> to vector<24x16xf32>
    %98 = vector.extract_strided_slice %54 {offsets = [0, 96], sizes = [24, 16], strides = [1, 1]} : vector<24x192xf32> to vector<24x16xf32>
    %99 = vector.extract_strided_slice %54 {offsets = [0, 160], sizes = [24, 16], strides = [1, 1]} : vector<24x192xf32> to vector<24x16xf32>
    %100 = arith.truncf %97 : vector<24x16xf32> to vector<24x16xbf16>
    %101 = arith.truncf %98 : vector<24x16xf32> to vector<24x16xbf16>
    %cst_33 = arith.constant dense<0.000000e+00> : vector<24x24xf32>
    %102 = tpu.matmul %100, %101, %cst_33 {dimension_numbers = #tpu.dot_dimension_numbers<[1], [1], [0], [0], [0, 0, 1, 0], [], []>} : vector<24x16xbf16>, vector<24x16xbf16>, vector<24x24xf32> -> vector<24x24xf32>
    %103 = vector.broadcast %8 : vector<1x24xf32> to vector<24x24xf32>
    %104 = arith.addf %102, %103 : vector<24x24xf32>
    %cst_34 = arith.constant dense<0xFF800000> : vector<24xf32>
    %105 = vector.multi_reduction <maximumf>, %104, %cst_34 [1] : vector<24x24xf32> to vector<24xf32>
    %106 = vector.shape_cast %105 : vector<24xf32> to vector<24x1xf32>
    %107 = vector.broadcast %106 : vector<24x1xf32> to vector<24x24xf32>
    %108 = arith.subf %104, %107 : vector<24x24xf32>
    %109 = math.exp %108 : vector<24x24xf32>
    %cst_35 = arith.constant dense<0.000000e+00> : vector<24xf32>
    %110 = vector.multi_reduction <add>, %109, %cst_35 [1] : vector<24x24xf32> to vector<24xf32>
    %111 = vector.shape_cast %110 : vector<24xf32> to vector<24x1xf32>
    %112 = tpu.reciprocal %111 {approx = true} : vector<24x1xf32> -> vector<24x1xf32>
    %113 = vector.broadcast %112 : vector<24x1xf32> to vector<24x24xf32>
    %114 = arith.mulf %109, %113 : vector<24x24xf32>
    %115 = arith.truncf %114 : vector<24x24xf32> to vector<24x24xbf16>
    %116 = arith.truncf %99 : vector<24x16xf32> to vector<24x16xbf16>
    %cst_36 = arith.constant dense<0.000000e+00> : vector<24x16xf32>
    %117 = tpu.matmul %115, %116, %cst_36 {dimension_numbers = #tpu.dot_dimension_numbers<[1], [0], [0], [1], [0, 0, 1, 1], [], []>} : vector<24x24xbf16>, vector<24x16xbf16>, vector<24x16xf32> -> vector<24x16xf32>
    %118 = vector.extract_strided_slice %54 {offsets = [0, 48], sizes = [24, 16], strides = [1, 1]} : vector<24x192xf32> to vector<24x16xf32>
    %119 = vector.extract_strided_slice %54 {offsets = [0, 112], sizes = [24, 16], strides = [1, 1]} : vector<24x192xf32> to vector<24x16xf32>
    %120 = vector.extract_strided_slice %54 {offsets = [0, 176], sizes = [24, 16], strides = [1, 1]} : vector<24x192xf32> to vector<24x16xf32>
    %121 = arith.truncf %118 : vector<24x16xf32> to vector<24x16xbf16>
    %122 = arith.truncf %119 : vector<24x16xf32> to vector<24x16xbf16>
    %cst_37 = arith.constant dense<0.000000e+00> : vector<24x24xf32>
    %123 = tpu.matmul %121, %122, %cst_37 {dimension_numbers = #tpu.dot_dimension_numbers<[1], [1], [0], [0], [0, 0, 1, 0], [], []>} : vector<24x16xbf16>, vector<24x16xbf16>, vector<24x24xf32> -> vector<24x24xf32>
    %124 = vector.broadcast %8 : vector<1x24xf32> to vector<24x24xf32>
    %125 = arith.addf %123, %124 : vector<24x24xf32>
    %cst_38 = arith.constant dense<0xFF800000> : vector<24xf32>
    %126 = vector.multi_reduction <maximumf>, %125, %cst_38 [1] : vector<24x24xf32> to vector<24xf32>
    %127 = vector.shape_cast %126 : vector<24xf32> to vector<24x1xf32>
    %128 = vector.broadcast %127 : vector<24x1xf32> to vector<24x24xf32>
    %129 = arith.subf %125, %128 : vector<24x24xf32>
    %130 = math.exp %129 : vector<24x24xf32>
    %cst_39 = arith.constant dense<0.000000e+00> : vector<24xf32>
    %131 = vector.multi_reduction <add>, %130, %cst_39 [1] : vector<24x24xf32> to vector<24xf32>
    %132 = vector.shape_cast %131 : vector<24xf32> to vector<24x1xf32>
    %133 = tpu.reciprocal %132 {approx = true} : vector<24x1xf32> -> vector<24x1xf32>
    %134 = vector.broadcast %133 : vector<24x1xf32> to vector<24x24xf32>
    %135 = arith.mulf %130, %134 : vector<24x24xf32>
    %136 = arith.truncf %135 : vector<24x24xf32> to vector<24x24xbf16>
    %137 = arith.truncf %120 : vector<24x16xf32> to vector<24x16xbf16>
    %cst_40 = arith.constant dense<0.000000e+00> : vector<24x16xf32>
    %138 = tpu.matmul %136, %137, %cst_40 {dimension_numbers = #tpu.dot_dimension_numbers<[1], [0], [0], [1], [0, 0, 1, 1], [], []>} : vector<24x24xbf16>, vector<24x16xbf16>, vector<24x16xf32> -> vector<24x16xf32>
    %139 = tpu.concatenate %75, %96, %117, %138 in 1 : vector<24x16xf32>, vector<24x16xf32>, vector<24x16xf32>, vector<24x16xf32> -> vector<24x64xf32>
    %140 = arith.truncf %139 : vector<24x64xf32> to vector<24x64xbf16>
    %cst_41 = arith.constant dense<0.000000e+00> : vector<24x64xf32>
    %141 = tpu.matmul %140, %22, %cst_41 {dimension_numbers = #tpu.dot_dimension_numbers<[1], [0], [0], [1], [0, 0, 1, 1], [], []>} : vector<24x64xbf16>, vector<64x64xbf16>, vector<24x64xf32> -> vector<24x64xf32>
    %142 = arith.addf %28, %141 : vector<24x64xf32>
    %143 = vector.broadcast %14 : vector<1x64xf32> to vector<24x64xf32>
    %144 = arith.addf %142, %143 : vector<24x64xf32>
    %cst_42 = arith.constant dense<0.000000e+00> : vector<24xf32>
    %145 = vector.multi_reduction <add>, %144, %cst_42 [1] : vector<24x64xf32> to vector<24xf32>
    %146 = vector.shape_cast %145 : vector<24xf32> to vector<24x1xf32>
    %cst_43 = arith.constant 6.400000e+01 : f32
    %147 = vector.broadcast %cst_43 : f32 to vector<24x1xf32>
    %148 = arith.divf %146, %147 : vector<24x1xf32>
    %149 = vector.broadcast %148 : vector<24x1xf32> to vector<24x64xf32>
    %150 = arith.subf %144, %149 : vector<24x64xf32>
    %151 = arith.mulf %150, %150 : vector<24x64xf32>
    %cst_44 = arith.constant dense<0.000000e+00> : vector<24xf32>
    %152 = vector.multi_reduction <add>, %151, %cst_44 [1] : vector<24x64xf32> to vector<24xf32>
    %153 = vector.shape_cast %152 : vector<24xf32> to vector<24x1xf32>
    %cst_45 = arith.constant 6.400000e+01 : f32
    %154 = vector.broadcast %cst_45 : f32 to vector<24x1xf32>
    %155 = arith.divf %153, %154 : vector<24x1xf32>
    %156 = vector.broadcast %148 : vector<24x1xf32> to vector<24x64xf32>
    %157 = arith.subf %144, %156 : vector<24x64xf32>
    %cst_46 = arith.constant 9.99999997E-7 : f32
    %158 = vector.broadcast %cst_46 : f32 to vector<24x1xf32>
    %159 = arith.addf %155, %158 : vector<24x1xf32>
    %160 = math.rsqrt %159 : vector<24x1xf32>
    %161 = vector.broadcast %160 : vector<24x1xf32> to vector<24x64xf32>
    %162 = arith.mulf %157, %161 : vector<24x64xf32>
    %163 = vector.broadcast %15 : vector<1x64xf32> to vector<24x64xf32>
    %164 = arith.mulf %162, %163 : vector<24x64xf32>
    %165 = vector.broadcast %16 : vector<1x64xf32> to vector<24x64xf32>
    %166 = arith.addf %164, %165 : vector<24x64xf32>
    %167 = arith.truncf %166 : vector<24x64xf32> to vector<24x64xbf16>
    %cst_47 = arith.constant dense<0.000000e+00> : vector<24x256xf32>
    %168 = tpu.matmul %167, %24, %cst_47 {dimension_numbers = #tpu.dot_dimension_numbers<[1], [0], [0], [1], [0, 0, 1, 1], [], []>} : vector<24x64xbf16>, vector<64x256xbf16>, vector<24x256xf32> -> vector<24x256xf32>
    %169 = vector.broadcast %17 : vector<1x256xf32> to vector<24x256xf32>
    %170 = arith.addf %168, %169 : vector<24x256xf32>
    %171 = arith.mulf %170, %170 : vector<24x256xf32>
    %172 = arith.mulf %170, %171 : vector<24x256xf32>
    %cst_48 = arith.constant 4.471500e-02 : f32
    %173 = vector.broadcast %cst_48 : f32 to vector<24x256xf32>
    %174 = arith.mulf %173, %172 : vector<24x256xf32>
    %175 = arith.addf %170, %174 : vector<24x256xf32>
    %cst_49 = arith.constant 0.797884583 : f32
    %176 = vector.broadcast %cst_49 : f32 to vector<24x256xf32>
    %177 = arith.mulf %176, %175 : vector<24x256xf32>
    %178 = math.tanh %177 : vector<24x256xf32>
    %cst_50 = arith.constant 1.000000e+00 : f32
    %179 = vector.broadcast %cst_50 : f32 to vector<24x256xf32>
    %180 = arith.addf %179, %178 : vector<24x256xf32>
    %cst_51 = arith.constant 5.000000e-01 : f32
    %181 = vector.broadcast %cst_51 : f32 to vector<24x256xf32>
    %182 = arith.mulf %181, %180 : vector<24x256xf32>
    %183 = arith.mulf %170, %182 : vector<24x256xf32>
    %184 = arith.truncf %183 : vector<24x256xf32> to vector<24x256xbf16>
    %cst_52 = arith.constant dense<0.000000e+00> : vector<24x64xf32>
    %185 = tpu.matmul %184, %26, %cst_52 {dimension_numbers = #tpu.dot_dimension_numbers<[1], [0], [0], [1], [0, 0, 1, 1], [], []>} : vector<24x256xbf16>, vector<256x64xbf16>, vector<24x64xf32> -> vector<24x64xf32>
    %186 = arith.addf %144, %185 : vector<24x64xf32>
    %187 = vector.broadcast %18 : vector<1x64xf32> to vector<24x64xf32>
    %188 = arith.addf %186, %187 : vector<24x64xf32>
    %c0_53 = arith.constant 0 : index
    %c0_54 = arith.constant 0 : index
    %c0_55 = arith.constant 0 : index
    %189 = vector.load %arg15[%c0_53, %c0_54, %c0_55] : memref<1x24x64xf32, #tpu.memory_space<vmem>>, vector<1x24x64xf32>
    %190 = vector.shape_cast %189 : vector<1x24x64xf32> to vector<24x64xf32>
    %191 = vector.shape_cast %188 : vector<24x64xf32> to vector<1x24x64xf32>
    tpu.vector_store %arg15[%c0_53, %c0_54, %c0_55], %191 {strides = array<i32>} : memref<1x24x64xf32, #tpu.memory_space<vmem>>, vector<1x24x64xf32>,
    %c1_i32 = arith.constant 1 : i32
    %192 = arith.cmpi eq, %arg1, %c1_i32 : i32
    %193 = arith.extui %192 : i1 to i32
    %c0_i32_56 = arith.constant 0 : i32
    %194 = arith.cmpi ne, %193, %c0_i32_56 : i32
    scf.if %194 {
      %c0_57 = arith.constant 0 : index
      %c0_58 = arith.constant 0 : index
      %195 = vector.load %arg10[%c0_57, %c0_58] : memref<2x64xf32, #tpu.memory_space<vmem>>, vector<1x64xf32>
      %c1 = arith.constant 1 : index
      %c0_59 = arith.constant 0 : index
      %196 = vector.load %arg10[%c1, %c0_59] : memref<2x64xf32, #tpu.memory_space<vmem>>, vector<1x64xf32>
      %c0_60 = arith.constant 0 : index
      %c0_61 = arith.constant 0 : index
      %c0_62 = arith.constant 0 : index
      %197 = vector.load %arg15[%c0_60, %c0_61, %c0_62] : memref<1x24x64xf32, #tpu.memory_space<vmem>>, vector<1x24x64xf32>
      %198 = vector.shape_cast %197 : vector<1x24x64xf32> to vector<24x64xf32>
      %cst_63 = arith.constant dense<0.000000e+00> : vector<24xf32>
      %199 = vector.multi_reduction <add>, %198, %cst_63 [1] : vector<24x64xf32> to vector<24xf32>
      %200 = vector.shape_cast %199 : vector<24xf32> to vector<24x1xf32>
      %cst_64 = arith.constant 6.400000e+01 : f32
      %201 = vector.broadcast %cst_64 : f32 to vector<24x1xf32>
      %202 = arith.divf %200, %201 : vector<24x1xf32>
      %203 = vector.broadcast %202 : vector<24x1xf32> to vector<24x64xf32>
      %204 = arith.subf %198, %203 : vector<24x64xf32>
      %205 = arith.mulf %204, %204 : vector<24x64xf32>
      %cst_65 = arith.constant dense<0.000000e+00> : vector<24xf32>
      %206 = vector.multi_reduction <add>, %205, %cst_65 [1] : vector<24x64xf32> to vector<24xf32>
      %207 = vector.shape_cast %206 : vector<24xf32> to vector<24x1xf32>
      %cst_66 = arith.constant 6.400000e+01 : f32
      %208 = vector.broadcast %cst_66 : f32 to vector<24x1xf32>
      %209 = arith.divf %207, %208 : vector<24x1xf32>
      %210 = vector.broadcast %202 : vector<24x1xf32> to vector<24x64xf32>
      %211 = arith.subf %198, %210 : vector<24x64xf32>
      %cst_67 = arith.constant 9.99999997E-7 : f32
      %212 = vector.broadcast %cst_67 : f32 to vector<24x1xf32>
      %213 = arith.addf %209, %212 : vector<24x1xf32>
      %214 = math.rsqrt %213 : vector<24x1xf32>
      %215 = vector.broadcast %214 : vector<24x1xf32> to vector<24x64xf32>
      %216 = arith.mulf %211, %215 : vector<24x64xf32>
      %217 = vector.broadcast %195 : vector<1x64xf32> to vector<24x64xf32>
      %218 = arith.mulf %216, %217 : vector<24x64xf32>
      %219 = vector.broadcast %196 : vector<1x64xf32> to vector<24x64xf32>
      %220 = arith.addf %218, %219 : vector<24x64xf32>
      %221 = arith.truncf %220 : vector<24x64xf32> to vector<24x64xbf16>
      %c0_68 = arith.constant 0 : index
      %c0_69 = arith.constant 0 : index
      %222 = vector.load %arg13[%c0_68, %c0_69] : memref<4x16xf32, #tpu.memory_space<vmem>>, vector<4x16xf32>
      %c0_70 = arith.constant 0 : index
      %c0_71 = arith.constant 0 : index
      %c0_72 = arith.constant 0 : index
      %223 = vector.load %arg11[%c0_70, %c0_71, %c0_72] : memref<3x4x24xbf16, #tpu.memory_space<vmem>>, vector<1x4x24xbf16>
      %224 = vector.shape_cast %223 : vector<1x4x24xbf16> to vector<4x24xbf16>
      %cst_73 = arith.constant dense<0.000000e+00> : vector<4x64xf32>
      %225 = tpu.matmul %224, %221, %cst_73 {dimension_numbers = #tpu.dot_dimension_numbers<[1], [0], [0], [1], [0, 0, 1, 1], [], []>} : vector<4x24xbf16>, vector<24x64xbf16>, vector<4x64xf32> -> vector<4x64xf32>
      %226 = arith.truncf %225 : vector<4x64xf32> to vector<4x64xbf16>
      %c0_74 = arith.constant 0 : index
      %c0_75 = arith.constant 0 : index
      %c0_76 = arith.constant 0 : index
      %227 = vector.load %arg12[%c0_74, %c0_75, %c0_76] : memref<3x64x16xbf16, #tpu.memory_space<vmem>>, vector<1x64x16xbf16>
      %228 = vector.shape_cast %227 : vector<1x64x16xbf16> to vector<64x16xbf16>
      %cst_77 = arith.constant dense<0.000000e+00> : vector<4x16xf32>
      %229 = tpu.matmul %226, %228, %cst_77 {dimension_numbers = #tpu.dot_dimension_numbers<[1], [0], [0], [1], [0, 0, 1, 1], [], []>} : vector<4x64xbf16>, vector<64x16xbf16>, vector<4x16xf32> -> vector<4x16xf32>
      %230 = arith.addf %222, %229 : vector<4x16xf32>
      %c1_78 = arith.constant 1 : index
      %c0_79 = arith.constant 0 : index
      %c0_80 = arith.constant 0 : index
      %231 = vector.load %arg11[%c1_78, %c0_79, %c0_80] : memref<3x4x24xbf16, #tpu.memory_space<vmem>>, vector<1x4x24xbf16>
      %232 = vector.shape_cast %231 : vector<1x4x24xbf16> to vector<4x24xbf16>
      %cst_81 = arith.constant dense<0.000000e+00> : vector<4x64xf32>
      %233 = tpu.matmul %232, %221, %cst_81 {dimension_numbers = #tpu.dot_dimension_numbers<[1], [0], [0], [1], [0, 0, 1, 1], [], []>} : vector<4x24xbf16>, vector<24x64xbf16>, vector<4x64xf32> -> vector<4x64xf32>
      %234 = arith.truncf %233 : vector<4x64xf32> to vector<4x64xbf16>
      %c1_82 = arith.constant 1 : index
      %c0_83 = arith.constant 0 : index
      %c0_84 = arith.constant 0 : index
      %235 = vector.load %arg12[%c1_82, %c0_83, %c0_84] : memref<3x64x16xbf16, #tpu.memory_space<vmem>>, vector<1x64x16xbf16>
      %236 = vector.shape_cast %235 : vector<1x64x16xbf16> to vector<64x16xbf16>
      %cst_85 = arith.constant dense<0.000000e+00> : vector<4x16xf32>
      %237 = tpu.matmul %234, %236, %cst_85 {dimension_numbers = #tpu.dot_dimension_numbers<[1], [0], [0], [1], [0, 0, 1, 1], [], []>} : vector<4x64xbf16>, vector<64x16xbf16>, vector<4x16xf32> -> vector<4x16xf32>
      %238 = arith.addf %230, %237 : vector<4x16xf32>
      %c2 = arith.constant 2 : index
      %c0_86 = arith.constant 0 : index
      %c0_87 = arith.constant 0 : index
      %239 = vector.load %arg11[%c2, %c0_86, %c0_87] : memref<3x4x24xbf16, #tpu.memory_space<vmem>>, vector<1x4x24xbf16>
      %240 = vector.shape_cast %239 : vector<1x4x24xbf16> to vector<4x24xbf16>
      %cst_88 = arith.constant dense<0.000000e+00> : vector<4x64xf32>
      %241 = tpu.matmul %240, %221, %cst_88 {dimension_numbers = #tpu.dot_dimension_numbers<[1], [0], [0], [1], [0, 0, 1, 1], [], []>} : vector<4x24xbf16>, vector<24x64xbf16>, vector<4x64xf32> -> vector<4x64xf32>
      %242 = arith.truncf %241 : vector<4x64xf32> to vector<4x64xbf16>
      %c2_89 = arith.constant 2 : index
      %c0_90 = arith.constant 0 : index
      %c0_91 = arith.constant 0 : index
      %243 = vector.load %arg12[%c2_89, %c0_90, %c0_91] : memref<3x64x16xbf16, #tpu.memory_space<vmem>>, vector<1x64x16xbf16>
      %244 = vector.shape_cast %243 : vector<1x64x16xbf16> to vector<64x16xbf16>
      %cst_92 = arith.constant dense<0.000000e+00> : vector<4x16xf32>
      %245 = tpu.matmul %242, %244, %cst_92 {dimension_numbers = #tpu.dot_dimension_numbers<[1], [0], [0], [1], [0, 0, 1, 1], [], []>} : vector<4x64xbf16>, vector<64x16xbf16>, vector<4x16xf32> -> vector<4x16xf32>
      %246 = arith.addf %238, %245 : vector<4x16xf32>
      %c0_93 = arith.constant 0 : index
      %c0_94 = arith.constant 0 : index
      %c0_95 = arith.constant 0 : index
      %247 = vector.load %arg14[%c0_93, %c0_94, %c0_95] : memref<1x4x16xf32, #tpu.memory_space<vmem>>, vector<1x4x16xf32>
      %248 = vector.shape_cast %247 : vector<1x4x16xf32> to vector<4x16xf32>
      %249 = vector.shape_cast %246 : vector<4x16xf32> to vector<1x4x16xf32>
      tpu.vector_store %arg14[%c0_93, %c0_94, %c0_95], %249 {strides = array<i32>} : memref<1x4x16xf32, #tpu.memory_space<vmem>>, vector<1x4x16xf32>,
    } else {
    }
    return
  }
  func.func @transform_0(%arg0: i32, %arg1: i32) -> (i32, i32, i32) {
    %c0_i32 = arith.constant 0 : i32
    %c0_i32_0 = arith.constant 0 : i32
    %c0_i32_1 = arith.constant 0 : i32
    return %arg0, %c0_i32, %c0_i32_0 : i32, i32, i32
  }
  func.func @transform_1(%arg0: i32, %arg1: i32) -> (i32, i32) {
    %c0_i32 = arith.constant 0 : i32
    %c0_i32_0 = arith.constant 0 : i32
    %c0_i32_1 = arith.constant 0 : i32
    return %c0_i32, %c0_i32_0 : i32, i32
  }
  func.func @transform_2(%arg0: i32, %arg1: i32) -> (i32, i32) {
    %c0_i32 = arith.constant 0 : i32
    %c0_i32_0 = arith.constant 0 : i32
    %c0_i32_1 = arith.constant 0 : i32
    return %c0_i32, %c0_i32_0 : i32, i32
  }
  func.func @transform_3(%arg0: i32, %arg1: i32) -> (i32, i32, i32) {
    %c0_i32 = arith.constant 0 : i32
    %c0_i32_0 = arith.constant 0 : i32
    %c0_i32_1 = arith.constant 0 : i32
    return %arg1, %c0_i32, %c0_i32_0 : i32, i32, i32
  }
  func.func @transform_4(%arg0: i32, %arg1: i32) -> (i32, i32, i32) {
    %c0_i32 = arith.constant 0 : i32
    %c0_i32_0 = arith.constant 0 : i32
    %c0_i32_1 = arith.constant 0 : i32
    return %arg1, %c0_i32, %c0_i32_0 : i32, i32, i32
  }
  func.func @transform_5(%arg0: i32, %arg1: i32) -> (i32, i32, i32) {
    %c0_i32 = arith.constant 0 : i32
    %c0_i32_0 = arith.constant 0 : i32
    %c0_i32_1 = arith.constant 0 : i32
    return %arg1, %c0_i32, %c0_i32_0 : i32, i32, i32
  }
  func.func @transform_6(%arg0: i32, %arg1: i32) -> (i32, i32, i32) {
    %c0_i32 = arith.constant 0 : i32
    %c0_i32_0 = arith.constant 0 : i32
    %c0_i32_1 = arith.constant 0 : i32
    return %arg1, %c0_i32, %c0_i32_0 : i32, i32, i32
  }
  func.func @transform_7(%arg0: i32, %arg1: i32) -> (i32, i32, i32) {
    %c0_i32 = arith.constant 0 : i32
    %c0_i32_0 = arith.constant 0 : i32
    %c0_i32_1 = arith.constant 0 : i32
    return %arg1, %c0_i32, %c0_i32_0 : i32, i32, i32
  }
  func.func @transform_8(%arg0: i32, %arg1: i32) -> (i32, i32) {
    %c0_i32 = arith.constant 0 : i32
    %c0_i32_0 = arith.constant 0 : i32
    %c0_i32_1 = arith.constant 0 : i32
    return %c0_i32, %c0_i32_0 : i32, i32
  }
  func.func @transform_9(%arg0: i32, %arg1: i32) -> (i32, i32, i32) {
    %c0_i32 = arith.constant 0 : i32
    %c0_i32_0 = arith.constant 0 : i32
    %c0_i32_1 = arith.constant 0 : i32
    %c0_i32_2 = arith.constant 0 : i32
    return %c0_i32, %c0_i32_0, %c0_i32_1 : i32, i32, i32
  }
  func.func @transform_10(%arg0: i32, %arg1: i32) -> (i32, i32, i32) {
    %c0_i32 = arith.constant 0 : i32
    %c0_i32_0 = arith.constant 0 : i32
    %c0_i32_1 = arith.constant 0 : i32
    %c0_i32_2 = arith.constant 0 : i32
    return %c0_i32, %c0_i32_0, %c0_i32_1 : i32, i32, i32
  }
  func.func @transform_11(%arg0: i32, %arg1: i32) -> (i32, i32) {
    %c0_i32 = arith.constant 0 : i32
    %c0_i32_0 = arith.constant 0 : i32
    %c0_i32_1 = arith.constant 0 : i32
    return %c0_i32, %c0_i32_0 : i32, i32
  }
  func.func @transform_12(%arg0: i32, %arg1: i32) -> (i32, i32, i32) {
    %c0_i32 = arith.constant 0 : i32
    %c0_i32_0 = arith.constant 0 : i32
    %c0_i32_1 = arith.constant 0 : i32
    return %arg0, %c0_i32, %c0_i32_0 : i32, i32, i32
  }
}

</mosaic_0001>

<bundles_post_ra>
// kernel: _lambda_.1
= control target key start
LH: loop header
LB: loop body
LE: loop exit
PB: predicated region body
PF: predicated region fallthrough
CT: control target
= control target key end

     0   :  { %s4125_s0 = inlined_call_operand.vmem [shape: bf16[2,24,192], index: 0, kind: input, shape index: {}]   ;;  %s4126_s1 = inlined_call_operand.vmem [shape: bf16[192,64], index: 1, kind: input, shape index: {}]   ;;  %s4127_s2 = inlined_call_operand.vmem [shape: f32[24,64], index: 2, kind: input, shape index: {}]   ;;  %s4128_s3 = inlined_call_operand.vmem [shape: f32[2,8,256], index: 3, kind: input, shape index: {}]   ;;  %s4129_s4 = inlined_call_operand.vmem [shape: bf16[2,64,192], index: 4, kind: input, shape index: {}]   ;;  %s4130_s5 = inlined_call_operand.vmem [shape: bf16[2,64,64], index: 5, kind: input, shape index: {}]   ;;  %s4131_s6 = inlined_call_operand.vmem [shape: bf16[2,64,256], index: 6, kind: input, shape index: {}]   ;;  %s4132_s7 = inlined_call_operand.vmem [shape: bf16[2,256,64], index: 7, kind: input, shape index: {}]   ;;  %s4133_s8 = inlined_call_operand.vmem [shape: f32[2,64], index: 8, kind: input, shape index: {}]   ;;  %s4134_s9 = inlined_call_operand.vmem [shape: bf16[3,4,24], index: 9, kind: input, shape index: {}]   ;;  %s4135_s10 = inlined_call_operand.vmem [shape: bf16[3,64,16], index: 10, kind: input, shape index: {}]   ;;  %s4136_s11 = inlined_call_operand.vmem [shape: f32[4,16], index: 11, kind: input, shape index: {}]   ;;  %s4137_s12 = inlined_call_operand.hbm [shape: f32[2,4,16], index: 12, kind: output, shape index: {}]  }
   0x1   :  { %4152 = sst [smem:[#allocation18_spill]] %s4125_s0 }
   0x2   :  { %4153 = sst [smem:[#allocation19_spill]] %s4136_s11 }
   0x3   :  { %4154 = sst [smem:[#allocation20_spill]] %s4137_s12 }
   0x4   :  { %17 = vsyncpa [#allocation4], 0 }
   0x5   :  { %19 = vsyncpa [#allocation4 + $0x1], 0  ;;  %s3524_s21 = smov 0   ;;  %s3526_s22 = smov 0  }
   0x6   :  { %s3528_s23 = smov 0   ;;  %s3530_s24 = smov 0  }
   0x7   :  { %s3532_s25 = smov 0   ;;  %s3534_s26 = smov 0  }
   0x8   :  { %s3536_s27 = smov 0   ;;  %s3538_s28 = smov 0  }
   0x9 LB: > { %4155 = sst [smem:[#allocation6_spill]] %s3416_s21  ;;  %s2686_s29 = sadd.s32 4294967295, %s3444_s28   ;;  %s3444_s28 = sphi %s3538_s28, %s25_s28   ;;  %s3440_s27 = sphi %s3536_s27, %s4186_s27   ;;  %s3436_s26 = sphi %s3534_s26, %s4185_s26   ;;  %s3432_s25 = sphi %s3532_s25, %s4184_s25   ;;  %s3428_s24 = sphi %s3530_s24, %s4183_s24   ;;  %s3424_s23 = sphi %s3528_s23, %s4182_s23   ;;  %s3420_s22 = sphi %s3526_s22, %s4181_s22   ;;  %s3416_s21 = sphi %s3524_s21, %s4180_s21  }
   0xa   : > { %4156 = sst [smem:[#allocation7_spill]] %s3420_s22  ;;  %s2687_s30 = sadd.s32 4294967294, %s3444_s28  }
   0xb   : > { %4157 = sst [smem:[#allocation8_spill]] %s3424_s23  ;;  %s34_s13 = sadd.s32 1, %s3436_s26 }
   0xc   : > { %4158 = sst [smem:[#allocation9_spill]] %s3432_s25  ;;  %p35_p0 = scmp.ge.s32.totalorder %s34_s13, 2 }
   0xd   : > { %4159 = sst [smem:[#allocation10_spill]] %s3436_s26  ;;  %s37_s14 = sadd.s32 1, %s3440_s27 }
   0xe   : > { %4160 = sst [smem:[#allocation11_spill]] %s3440_s27  ;;  %p336_p1 = scmp.ne.s32.totalorder %s3424_s23, %s3420_s22 }
   0xf   : > { %4161 = sst [smem:[#allocation12_spill]] %s3444_s28  ;;  %p337_p2 = scmp.eq.s32.totalorder %s2686_s29, 3 }
  0x10   : > { %s4188_s13 = smov (%p35_p0, %s34_s13), 0  ;;  %s4190_s14 = smov (!%p35_p0, %s37_s14), %s3440_s27 }
  0x11   : > { %4162 = sst [smem:[#allocation13_spill]] %s4188_s13  ;;  %p3573_p3 = por %p337_p2, %p336_p1 }
  0x12   : > { %p342_p4 = scmp.ne.s32.totalorder %s3420_s22, %s3416_s21  ;;  %p39_p5 = scmp.ge.s32.totalorder %s4190_s14, 2 }
  0x13   : > { %s4163_s15 = scalar_select %p3573_p3, 1, 0 }
  0x14   : > { %p343_p6 = scmp.eq.s32.totalorder %s2687_s30, 3  ;;  %p2690_p7 = scmp.ge.s32.totalorder %s3444_s28, 1 }
  0x15   : > { %4164 = sst [smem:[#allocation14_spill]] %s4163_s15  ;;  %p427_p8 = scmp.lt.s32.totalorder %s3444_s28, 5 }
  0x16   : > { %s4192_s14 = smov (%p39_p5, %s4190_s14), 0  ;;  %p3583_p9 = por %p343_p6, %p342_p4 }
  0x17   : > { %4165 = sst [smem:[#allocation15_spill]] %s4192_s14  ;;  %p428_p10 = pnand %p2690_p7, %p427_p8 }
  0x18   : > { %s4166_s16 = scalar_select %p3583_p9, 1, 0 }
  0x19   : > { %s323_s17 = ssub.s32 %s3440_s27, %s4192_s14  ;;  %s326_s18 = sadd.s32 1, %s3424_s23 }
  0x1a   : > { %4167 = sst [smem:[#allocation16_spill]] %s4166_s16  ;;  %p324_p11 = scmp.eq.s32.totalorder %s323_s17, 0 }
  0x1b   : > { %431 = sbr.rel (%p428_p10) target bundleno = 4511 (0x119f), region = 68  ;;  %s4146_s20 = sand.u32 (!%p428_p10), 1, %s3420_s22  }
  0x1c   : > { %s3591_s19 = scalar_select %p324_p11, %s3424_s23, %s326_s18  }
  0x1d   : > { %p494_p12 = scmp.lt.s32.totalorder (!%p428_p10), %s3432_s25, 1  ;;  %s3597_s29 = sshll.u32 (!%p428_p10), %s4146_s20, 2 }
  0x1e   : > { %4168 = sst [smem:[#allocation17_spill]] %s3591_s19  ;;  %p499_p13 = scmp.lt.s32.totalorder (!%p428_p10), %s3428_s24, 1 }
  0x1f   : > { %s4169_s0 = sld [smem:[#allocation18_spill]] (!%p428_p10)  ;;  %s493_s28 = scalar_lea.vmem (!%p428_p10), [#allocation3], %s3597_s29 }
  0x20   : > { %p2703_p0 = scmp.ne.s32.totalorder (!%p428_p10), %s3428_s24, 0 }
  0x22   : > { %s495_s30 = scalar_select %p494_p12, %s3432_s25, 1 }
  0x23   : > { %s500_s14 = scalar_select %p499_p13, %s3428_s24, 1 }
  0x24   : > { %s3096_s13 = smul.u32 24, %s495_s30  ;;  %v3180_v0 = vld [vmem:[%s4126_s1] sm:$0xff] (!%p2703_p0)   ;;  %v3446_v1 = vmov (!%p2703_p0), 0   ;;  %v3181_v2 = vld [vmem:[%s4126_s1 + $0x8] sm:$0xff] (!%p2703_p0)   ;;  %v3182_v3 = vld [vmem:[%s4126_s1 + $0x10] sm:$0xff] (!%p2703_p0)   ;;  %vm646_vm0 = vcmask (!%p2703_p0), 523264  }
  0x25   : > { %s2823_s17 = sshll.u32 %s500_s14, 4  ;;  %s2824_s18 = sshll.u32 %s500_s14, 6  ;;  %653 = vmatprep.subr.bf16.mxu0 (!%p2703_p0), %v3446_v1  ;;  %3054 = vmatprep.subr.bf16.mxu1 (!%p2703_p0), %v3446_v1  ;;  %v3183_v4 = vld [vmem:[%s4126_s1 + $0x18] sm:$0xff] (!%p2703_p0)   ;;  %v3184_v7 = vld [vmem:[%s4126_s1 + $0x20] sm:$0xff] (!%p2703_p0)   ;;  %v3185_v9 = vld [vmem:[%s4126_s1 + $0x28] sm:$0xff] (!%p2703_p0)  }
  0x26   : > { %s3605_s19 = scalar_lea.vmem %s4169_s0, %s3096_s13  ;;  %s3610_s21 = scalar_lea.vmem %s4128_s3, %s2823_s17  ;;  %654 = vmatpush1.bf16.msra.mxu0 (!%p2703_p0), %v3180_v0  ;;  %3066 = vmatpush1.bf16.msra.mxu1 (!%p2703_p0), %v3180_v0  ;;  %v3186_v10 = vld [vmem:[%s4126_s1 + $0x30] sm:$0xff] (!%p2703_p0)   ;;  %v3187_v11 = vld [vmem:[%s4126_s1 + $0x38] sm:$0xff] (!%p2703_p0)   ;;  %v3188_v12 = vld [vmem:[%s4126_s1 + $0x40] sm:$0xff] (!%p2703_p0)  }
  0x27   : > { %s3615_s12 = scalar_lea.vmem %s4129_s4, %s2824_s18  ;;  %s2825_s15 = sshll.u32 %s500_s14, 5  ;;  %655 = vmatprep.subr.bf16.mxu0 (!%p2703_p0), %v3446_v1  ;;  %3055 = vmatprep.subr.bf16.mxu1 (!%p2703_p0), %v3446_v1  ;;  %v3194_v5 = vld [vmem:[%s3605_s19 + $0x4] ss:$8 sps:$4 sm:$0xff] (!%p2703_p0)   ;;  %v531_v6 = vld [vmem:[%s3605_s19 + $0x10] sm:$0xff] (!%p2703_p0)  ;;  %v3191_v15 = vld [vmem:[%s4126_s1 + $0x58] sm:$0xff] (!%p2703_p0)  }
  0x28   : > { %s3620_s25 = scalar_lea.vmem %s4130_s5, %s2825_s15  ;;  %s3625_s27 = scalar_lea.vmem %s4131_s6, %s2824_s18  ;;  %v2707_v8 = vcombine.high (!%p2703_p0), %v531_v6, %v531_v6  ;;  %2720 = vmatprep.mubr.msk.bf16.mxu0 (!%p2703_p0), %vm646_vm0, %v3194_v5  ;;  %v3189_v13 = vld [vmem:[%s4126_s1 + $0x48] sm:$0xff] (!%p2703_p0)   ;;  %v3190_v14 = vld [vmem:[%s4126_s1 + $0x50] sm:$0xff] (!%p2703_p0)   ;;  %v2706_v17 = vcombine.low (!%p2703_p0), %v531_v6, %v531_v6  ;;  %v556_v18 = vld [vmem:[%s4127_s2] sm:$0xff] (!%p2703_p0) }
  0x29   : > { %s2827_s13 = sshll.u32 %s500_s14, 7  ;;  %528 = sbr.rel (%p2703_p0) target bundleno = 302 (0x12e), region = 72  ;;  %v3192_v16 = vld [vmem:[%s3605_s19] ss:$8 sps:$4 sm:$0xff] (!%p2703_p0)   ;;  %v558_v19 = vld [vmem:[%s4127_s2 + $0x10] sm:$0xff] (!%p2703_p0) }
  0x2a   : > { %s3630_s17 = scalar_lea.vmem %s4132_s7, %s2827_s13  ;;  %656 = vmatpush1.bf16.msra.mxu0 (!%p2703_p0), %v3181_v2  ;;  %3067 = vmatpush1.bf16.msra.mxu1 (!%p2703_p0), %v3181_v2  ;;  %v557_v22 = vld [vmem:[%s4127_s2 + $0x8] sm:$0xff] (!%p2703_p0) }
  0x2b   : > { %657 = vmatprep.subr.bf16.mxu0 (!%p2703_p0), %v3446_v1  ;;  %3056 = vmatprep.subr.bf16.mxu1 (!%p2703_p0), %v3446_v1 }
  0x2c   : > { %2721 = vmatprep.mubr.msk.bf16.mxu1 (!%p2703_p0), %vm646_vm0, %v2707_v8 }
  0x2e   : > { %658 = vmatpush1.bf16.msra.mxu0 (!%p2703_p0), %v3182_v3  ;;  %3068 = vmatpush1.bf16.msra.mxu1 (!%p2703_p0), %v3182_v3 }
  0x2f   : > { %659 = vmatprep.subr.bf16.mxu0 (!%p2703_p0), %v3446_v1  ;;  %3057 = vmatprep.subr.bf16.mxu1 (!%p2703_p0), %v3446_v1 }
  0x32   : > { %660 = vmatpush1.bf16.msra.mxu0 %v3183_v4  ;;  %3069 = vmatpush1.bf16.msra.mxu1 %v3183_v4 }
  0x33   : > { %661 = vmatprep.subr.bf16.mxu0 %v3446_v1  ;;  %3058 = vmatprep.subr.bf16.mxu1 %v3446_v1 }
  0x36   : > { %662 = vmatpush1.bf16.msra.mxu0 %v3184_v7  ;;  %3070 = vmatpush1.bf16.msra.mxu1 %v3184_v7 }
  0x37   : > { %663 = vmatprep.subr.bf16.mxu0 %v3446_v1  ;;  %3059 = vmatprep.subr.bf16.mxu1 %v3446_v1 }
  0x3a   : > { %664 = vmatpush1.bf16.msra.mxu0 %v3185_v9  ;;  %3071 = vmatpush1.bf16.msra.mxu1 %v3185_v9 }
  0x3b   : > { %665 = vmatprep.subr.bf16.mxu0 %v3446_v1  ;;  %3060 = vmatprep.subr.bf16.mxu1 %v3446_v1 }
  0x3e   : > { %666 = vmatpush1.bf16.msra.mxu0 %v3186_v10  ;;  %3072 = vmatpush1.bf16.msra.mxu1 %v3186_v10 }
  0x3f   : > { %667 = vmatprep.subr.bf16.mxu0 %v3446_v1  ;;  %3061 = vmatprep.subr.bf16.mxu1 %v3446_v1 }
  0x42   : > { %668 = vmatpush1.bf16.msra.mxu0 %v3187_v11  ;;  %3073 = vmatpush1.bf16.msra.mxu1 %v3187_v11 }
  0x43   : > { %669 = vmatprep.subr.bf16.mxu0 %v3446_v1  ;;  %3062 = vmatprep.subr.bf16.mxu1 %v3446_v1 }
  0x46   : > { %670 = vmatpush1.bf16.msra.mxu0 %v3188_v12  ;;  %3074 = vmatpush1.bf16.msra.mxu1 %v3188_v12 }
  0x47   : > { %671 = vmatprep.subr.bf16.mxu0 %v3446_v1  ;;  %3063 = vmatprep.subr.bf16.mxu1 %v3446_v1 }
  0x4a   : > { %672 = vmatpush1.bf16.msra.mxu0 %v3189_v13  ;;  %3075 = vmatpush1.bf16.msra.mxu1 %v3189_v13 }
  0x4b   : > { %673 = vmatprep.subr.bf16.mxu0 %v3446_v1  ;;  %3064 = vmatprep.subr.bf16.mxu1 %v3446_v1 }
  0x4e   : > { %674 = vmatpush1.bf16.msra.mxu0 %v3190_v14  ;;  %3076 = vmatpush1.bf16.msra.mxu1 %v3190_v14 }
  0x4f   : > { %675 = vmatprep.subr.bf16.mxu0 %v3446_v1  ;;  %3065 = vmatprep.subr.bf16.mxu1 %v3446_v1 }
  0x52   : > { %676 = vmatpush1.bf16.msra.mxu0 %v3191_v15  ;;  %3077 = vmatpush1.bf16.msra.mxu1 %v3191_v15 }
  0x55   : > { %686 = vmatmul.mubr.bf16.vlgmr.msra.gmra.mrb[0].mxu0 %v3192_v16  ;;  %694 = vmatmul.mubr.bf16.vlgmr.msra.gmra.mrb[0].mxu1 %v2706_v17 }
 0x128   : > { %v687_v20 = vpop.f32.mrb[0].mxu0  ;;  %v695_v21 = vpop.f32.mrb[0].mxu1 }
 0x129   : > { %v688_v23 = vadd.f32 %v687_v20, %v556_v18  ;;  %v696_v24 = vadd.f32 %v695_v21, %v558_v19  ;;  %v689_v25 = vpop.f32.mrb[1].mxu0  ;;  %v697_v26 = vpop.f32.mrb[1].mxu1 }
 0x12a   : > { %v690_v27 = vpop.f32.mrb[2].mxu0  ;;  %v698_v28 = vpop.f32.mrb[2].mxu1 }
 0x12b   : > { %701 = vst.msk [vmem:[#allocation2] sm:$0xff] %vm646_vm0, %v688_v23  ;;  %703 = vst.msk [vmem:[#allocation2 + $0x10] sm:$0xff] %vm646_vm0, %v696_v24  ;;  %v691_v29 = vadd.f32 %v690_v27, %v557_v22  ;;  %v692_v30 = vpop.f32.mrb[3].mxu0  ;;  %v699_v31 = vpop.f32.mrb[3].mxu1 }
 0x12d   : > { %702 = vst.msk [vmem:[#allocation2 + $0x8] sm:$0xff] %vm646_vm0, %v691_v29 }
 0x12e PF: > { %vm769_vm1 = vcmask 523264   ;;  %v3212_v53 = vld [vmem:[%s3615_s12 + $0x4] ss:$8 sps:$4 sm:$0xff]   ;;  %v3214_v54 = vld [vmem:[%s3615_s12] ss:$8 sps:$4 sm:$0xff]   ;;  %v3447_v61 = vmov 0   ;;  %v704_v5 = vlaneseq }
 0x12f   : > { %880 = vmatprep.subr.bf16.mxu1 %v3212_v53  ;;  %v3215_v55 = vld [vmem:[%s3615_s12 + $0x14] ss:$8 sps:$4 sm:$0xff]   ;;  %v3217_v56 = vld [vmem:[%s3615_s12 + $0x10] ss:$8 sps:$4 sm:$0xff]   ;;  %v3218_v57 = vld [vmem:[%s3615_s12 + $0x24] ss:$8 sps:$4 sm:$0xff]   ;;  %912 = vmatprep.mubr.bf16.mxu1 %v3447_v61 }
 0x130   : > { %881 = vmatpush1.bf16.msra.mxu1 %v3214_v54  ;;  %v3220_v58 = vld [vmem:[%s3615_s12 + $0x20] ss:$8 sps:$4 sm:$0xff]   ;;  %v3221_v59 = vld [vmem:[%s3615_s12 + $0x34] ss:$8 sps:$4 sm:$0xff]   ;;  %v3223_v60 = vld [vmem:[%s3615_s12 + $0x30] ss:$8 sps:$4 sm:$0xff]  }
 0x131   : > { %882 = vmatprep.subr.bf16.mxu1 %v3215_v55  ;;  %v3703_v8 = vshrl.u32 %v704_v5, 7  ;;  %v3707_v10 = vld [vmem:[%s3610_s21] sm:$0xff]  ;;  %v3717_v29 = vld [vmem:[%s3610_s21 + $0x8] sm:$0xff]  ;;  %vm939_vm2 = vcmask 130048   ;;  %s3448_s12 = smov 48   ;;  %s3449_s19 = smov 64  }
 0x132   : > { %v766_v32 = vld [vmem:[#allocation2] sm:$0xff]  ;;  %v768_v33 = vld [vmem:[#allocation2 + $0x10] sm:$0xff]  ;;  %s3450_s0 = smov 112   ;;  %s3451_s18 = smov 96   ;;  %vm1044_vm3 = vcmask 1043456   ;;  %vm1000_vm5 = vcmask 195584  }
 0x133   : > { %v770_v35 = vsel %vm769_vm1, %v766_v32, 0.0  ;;  %v776_v36 = vsel %vm769_vm1, %v768_v33, 0.0  ;;  %v812_v9 = vsub.s32 0, %v3703_v8  ;;  %v819_v14 = vsub.s32 1, %v3703_v8  ;;  %s3452_s30 = smov 32   ;;  %s3454_s26 = smov 16  }
 0x134   : > { %v767_v34 = vld [vmem:[#allocation2 + $0x8] sm:$0xff]  ;;  %771 = vadd.xlane.f32.xlu0 %v770_v35  ;;  %777 = vadd.xlane.f32.xlu1 %v776_v36  ;;  %v828_v28 = vsub.s32 2, %v3703_v8  ;;  %s3455_s13 = smov 80   ;;  %vm1632_vm6 = vcmask 261120   ;;  %vm1636_vm7 = vcmask 392192   ;;  %p2780_p1 = scmp.ne.s32.totalorder %s3428_s24, 1 }
 0x135   : > { %v773_v37 = vsel %vm769_vm1, %v767_v34, 0.0  ;;  %883 = vmatpush1.bf16.msra.mxu1 %v3217_v56  ;;  %v813_v13 = vrot.slane %v3707_v10, %v812_v9  ;;  %v820_v19 = vrot.slane %v3707_v10, %v819_v14  ;;  %vm3457_vm8 = vmmov (!%p2780_p1), 0  }
 0x136   : > { %884 = vmatprep.subr.bf16.mxu1 %v3218_v57  ;;  %v829_v30 = vrot.slane %v3707_v10, %v828_v28  ;;  %vm2540_vm9 = vcmask (!%p2780_p1), 125952  }
 0x138   : > { %774 = vadd.xlane.f32.xlu0 %v773_v37 }
 0x139   : > { %885 = vmatpush1.bf16.msra.mxu1 %v3220_v58 }
 0x13a   : > { %886 = vmatprep.subr.bf16.mxu1 %v3221_v59 }
 0x13d   : > { %887 = vmatpush1.bf16.msra.mxu1 %v3223_v60 }
 0x1c1   : > { %v772_v38 = vpop.xlane.xlu0 %771  ;;  %v778_v39 = vpop.xlane.xlu1 %777 }
 0x1c2   : > { %v780_v40 = vmul.f32 0.015625, %v772_v38  ;;  %v782_v41 = vmul.f32 0.015625, %v778_v39 }
 0x1c4   : > { %v783_v42 = vsub.f32 %v766_v32, %v780_v40  ;;  %v785_v43 = vsub.f32 %v768_v33, %v782_v41  ;;  %v833_v32 = vrot.slane %v3717_v29, %v828_v28 }
 0x1c5   : > { %v775_v44 = vpop.xlane.xlu0 %774 }
 0x1c6   : > { %v781_v45 = vmul.f32 0.015625, %v775_v44  ;;  %v786_v46 = vmul.f32 %v783_v42, %v783_v42  ;;  %v788_v47 = vmul.f32 %v785_v43, %v785_v43 }
 0x1c8   : > { %v784_v48 = vsub.f32 %v767_v34, %v781_v45  ;;  %v789_v49 = vsel %vm769_vm1, %v786_v46, 0.0  ;;  %v795_v50 = vsel %vm769_vm1, %v788_v47, 0.0 }
 0x1c9   : > { %790 = vadd.xlane.f32.xlu1 %v789_v49 }
 0x1ca   : > { %v787_v51 = vmul.f32 %v784_v48, %v784_v48 }
 0x1cc   : > { %v792_v52 = vsel %vm769_vm1, %v787_v51, 0.0 }
 0x1cd   : > { %796 = vadd.xlane.f32.xlu1 %v795_v50  ;;  %793 = vadd.xlane.f32.xlu0 %v792_v52 }
 0x256   : > { %v791_v62 = vpop.xlane.xlu1 %790 }
 0x257   : > { %v798_v63 = vmul.f32 0.015625, %v791_v62 }
 0x259   : > { %v801_v0 = vadd.f32 1e-06, %v798_v63 }
 0x25a   : > { %v797_v1 = vpop.xlane.xlu1 %796  ;;  %v794_v2 = vpop.xlane.xlu0 %793 }
 0x25b   : > { %3256 = vrsqrt.f32 %v801_v0  ;;  %v800_v3 = vmul.f32 0.015625, %v797_v1  ;;  %v799_v4 = vmul.f32 0.015625, %v794_v2 }
 0x25d   : > { %v803_v6 = vadd.f32 1e-06, %v800_v3  ;;  %v802_v7 = vadd.f32 1e-06, %v799_v4  ;;  %v705_v4 = vand.u32 127, %v704_v5 }
 0x25f   : > { %3258 = vrsqrt.f32 %v803_v6  ;;  %vm706_vm4 = vcmp.lt.s32.totalorder %v705_v4, 17  ;;  %v3453_v6 = vmov -1e+30  }
 0x260   : > { %3260 = vrsqrt.f32 %v802_v7  ;;  %v3774_v7 = vsel %vm706_vm4, 0.0, %v3453_v6 }
 0x265   : > { %v3257_v11 = vpop.eup %3256 }
 0x266   : > { %v807_v12 = vmul.f32 %v3257_v11, %v783_v42 }
 0x268   : > { %v814_v18 = vmul.f32 %v813_v13, %v807_v12 }
 0x269   : > { %v3259_v15 = vpop.eup %3258 }
 0x26a   : > { %v3261_v16 = vpop.eup %3260  ;;  %v809_v21 = vmul.f32 %v3259_v15, %v785_v43  ;;  %v821_v22 = vadd.f32 %v820_v19, %v814_v18 }
 0x26b   : > { %v808_v17 = vmul.f32 %v3261_v16, %v784_v48 }
 0x26c   : > { %v816_v25 = vmul.f32 %v813_v13, %v809_v21 }
 0x26d   : > { %v815_v20 = vmul.f32 %v813_v13, %v808_v17 }
 0x26e   : > { %v823_v26 = vadd.f32 %v820_v19, %v816_v25 }
 0x26f   : > { %v822_v23 = vadd.f32 %v820_v19, %v815_v20 }
 0x270   : > { %v825_v27 = vpack.c.bf16 %v823_v26, %v823_v26 }
 0x271   : > { %v824_v24 = vpack.c.bf16 %v822_v23, %v821_v22 }
 0x273   : > { %2730 = vmatmul.mubr.msk.bf16.vlgmr.msra.gmra.mrb[0].mxu1 %vm769_vm1, %v824_v24 }
 0x274   : > { %922 = vmatprep.mubr.bf16.mxu1 %v3447_v61 }
 0x27b   : > { %2731 = vmatmul.mubr.msk.bf16.gmra.mrb[4].mxu1 %vm769_vm1, %v825_v27 }
 0x346   : > { %v914_v31 = vpop.f32.mrb[0].mxu1 }
 0x347   : > { %v916_v33 = vpop.f32.mrb[1].mxu1  ;;  %v915_v35 = vadd.f32 %v914_v31, %v829_v30 }
 0x348   : > { %v918_v34 = vpop.f32.mrb[2].mxu1  ;;  %v917_v38 = vadd.f32 %v916_v33, %v833_v32 }
 0x349   : > { %v919_v36 = vadd.f32 %v918_v34, %v829_v30  ;;  %v920_v37 = vpop.f32.mrb[3].mxu1 }
 0x34a   : > { %v921_v39 = vadd.f32 %v920_v37, %v833_v32 }
 0x34b   : > { %v3721_v40 = vpack.c.bf16 %v919_v36, %v915_v35 }
 0x34c   : > { %v3723_v41 = vpack.c.bf16 %v921_v39, %v917_v38 }
 0x34d   : > { %1100 = vrot.lane.b32.xlu1 %v3721_v40, %s3448_s12  ;;  %935 = vrot.lane.b32.xlu0 %v3721_v40, %s3449_s19 }
 0x34e   : > { %2922 = vmatprep.mubr.msk.bf16.mxu1 %vm939_vm2, %v3721_v40  ;;  %v924_v42 = vpop.f32.mrb[4].mxu1 }
 0x34f   : > { %v925_v43 = vadd.f32 %v924_v42, %v829_v30  ;;  %v926_v44 = vpop.f32.mrb[5].mxu1 }
 0x350   : > { %v928_v45 = vpop.f32.mrb[6].mxu1  ;;  %v927_v57 = vadd.f32 %v926_v44, %v833_v32 }
 0x351   : > { %v3730_v46 = vpack.c.bf16 %v925_v43, %v925_v43  ;;  %v929_v47 = vpop.f32.mrb[7].mxu1  ;;  %1096 = vrot.lane.b32.xlu0 %v3721_v40, %s3450_s0 }
 0x352   : > { %v3758_v60 = vpack.c.bf16 %v927_v57, %v927_v57 }
 0x353   : > { %937 = vrot.lane.b32.xlu1 %v3730_v46, %s3449_s19 }
 0x354   : > { %v1046_v1 = vsel %vm1044_vm3, %v3758_v60, 0 }
 0x355   : > { %1098 = vrot.lane.b32.xlu0 %v3730_v46, %s3450_s0 }
 0x357   : > { %1102 = vrot.lane.b32.xlu1 %v3730_v46, %s3448_s12 }
 0x359   : > { %1263 = vrot.lane.b32.xlu0 %v3721_v40, %s3451_s18 }
 0x35b   : > { %1267 = vrot.lane.b32.xlu1 %v3721_v40, %s3452_s30 }
 0x35f   : > { %1269 = vrot.lane.b32.xlu1 %v3730_v46, %s3452_s30 }
 0x363   : > { %1265 = vrot.lane.b32.xlu1 %v3730_v46, %s3451_s18 }
 0x3bf   : > { %v1101_v48 = vpop.permute.xlu1 %1100  ;;  %v936_v49 = vpop.permute.xlu0 %935 }
 0x3c0   : > { %v947_v50 = vsel %vm939_vm2, %v936_v49, 0  ;;  %3084 = vmatprep.subr.msk.bf16.mxu1 %vm939_vm2, %v936_v49  ;;  %3087 = vmatprep.subr.msk.bf16.mxu0 %vm939_vm2, %v1101_v48  ;;  %v1111_v51 = vsel %vm939_vm2, %v1101_v48, 0 }
 0x3c1   : > { %2919 = vmatpush3.bf16.xpose.msra.mxu1 %v947_v50  ;;  %2935 = vmatpush3.bf16.xpose.msra.mxu0 %v1111_v51 }
 0x3c3   : > { %v1097_v52 = vpop.permute.xlu0 %1096 }
 0x3c4   : > { %2938 = vmatprep.mubr.msk.bf16.mxu0 %vm939_vm2, %v1097_v52 }
 0x3c5   : > { %v938_v53 = vpop.permute.xlu1 %937 }
 0x3c6   : > { %3085 = vmatprep.subr.msk.bf16.mxu1 %vm939_vm2, %v938_v53  ;;  %v950_v54 = vsel %vm939_vm2, %v938_v53, 0 }
 0x3c7   : > { %v1099_v58 = vpop.permute.xlu0 %1098 }
 0x3c9   : > { %v1103_v55 = vpop.permute.xlu1 %1102  ;;  %2921 = vmatpush3.bf16.xpose.msra.mxu1 %v950_v54 }
 0x3ca   : > { %2926 = vmatprep.subr.bf16.mxu1 %v3723_v41  ;;  %3088 = vmatprep.subr.msk.bf16.mxu0 %vm939_vm2, %v1103_v55  ;;  %v1114_v56 = vsel %vm939_vm2, %v1103_v55, 0 }
 0x3cb   : > { %2937 = vmatpush3.bf16.xpose.msra.mxu0 %v1114_v56  ;;  %v1264_v62 = vpop.permute.xlu0 %1263 }
 0x3cd   : > { %v1268_v59 = vpop.permute.xlu1 %1267 }
 0x3ce   : > { %3090 = vmatprep.subr.msk.bf16.mxu0 %vm939_vm2, %v1268_v59  ;;  %v1278_v63 = vsel %vm939_vm2, %v1268_v59, 0 }
 0x3d0   : > { %2923 = vmatmul.mubr.msk.bf16.vlgmr.msra.gmra.mrb[8].mxu1 %vm939_vm2, %v3730_v46 }
 0x3d1   : > { %2927 = vmatpush3.bf16.msra.mxu1 %v3723_v41  ;;  %v1270_v0 = vpop.permute.xlu1 %1269 }
 0x3d2   : > { %3086 = vmatprep.subr.msk.bf16.mxu1 %vm1044_vm3, %v3758_v60  ;;  %2939 = vmatmul.mubr.msk.bf16.vlgmr.msra.gmra.mrb[0].mxu0 %vm939_vm2, %v1099_v58  ;;  %v1281_v2 = vsel %vm939_vm2, %v1270_v0, 0 }
 0x3d3   : > { %2951 = vmatpush3.bf16.xpose.msra.mxu0 %v1278_v63  ;;  %2954 = vmatprep.mubr.msk.bf16.mxu0 %vm939_vm2, %v1264_v62 }
 0x3d4   : > { %3091 = vmatprep.subr.msk.bf16.mxu0 %vm939_vm2, %v1270_v0 }
 0x3d5   : > { %2929 = vmatpush3.bf16.msra.mxu1 %v1046_v1  ;;  %v1266_v3 = vpop.permute.xlu1 %1265 }
 0x3db   : > { %2953 = vmatpush3.bf16.xpose.msra.mxu0 %v1281_v2 }
 0x3e2   : > { %2955 = vmatmul.mubr.msk.bf16.vlgmr.msra.gmra.mrb[4].mxu0 %vm939_vm2, %v1266_v3 }
 0x4a3   : > { %v2924_v9 = vpop.f32.mrb[8].mxu1 }
 0x4a4   : > { %v986_v11 = vpop.f32.mrb[9].mxu1  ;;  %v995_v17 = vadd.f32 %v2924_v9, %v3774_v7 }
 0x4a5   : > { %v987_v12 = vadd.f32 %v986_v11, %v3774_v7  ;;  %v2925_v13 = vpop.f32.mrb[10].mxu1  ;;  %v2940_v14 = vpop.f32.mrb[0].mxu0 }
 0x4a6   : > { %v989_v15 = vpop.f32.mrb[11].mxu1  ;;  %v1150_v16 = vpop.f32.mrb[1].mxu0  ;;  %v1159_v21 = vadd.f32 %v2940_v14, %v3774_v7  ;;  %v1007_v24 = vsel %vm1000_vm5, %v995_v17, -inf }
 0x4a7   : > { %v990_v18 = vadd.f32 %v989_v15, %v3774_v7  ;;  %v2941_v19 = vpop.f32.mrb[2].mxu0  ;;  %v1001_v5 = vsel %vm1000_vm5, %v987_v12, -inf  ;;  %v1151_v23 = vadd.f32 %v1150_v16, %v3774_v7 }
 0x4a8   : > { %v1153_v20 = vpop.f32.mrb[3].mxu0  ;;  %1002 = vmax.xlane.f32.xlu0 %v1001_v5  ;;  %v1170_v25 = vsel %vm1000_vm5, %v1159_v21, -inf }
 0x4a9   : > { %v1004_v22 = vsel %vm1000_vm5, %v990_v18, -inf  ;;  %v1154_v26 = vadd.f32 %v1153_v20, %v3774_v7  ;;  %v1164_v27 = vsel %vm1000_vm5, %v1151_v23, -inf }
 0x4aa   : > { %1005 = vmax.xlane.f32.xlu1 %v1004_v22 }
 0x4ab   : > { %v1167_v28 = vsel %vm1000_vm5, %v1154_v26, -inf }
 0x4ac   : > { %1008 = vmax.xlane.f32.xlu0 %v1007_v24 }
 0x4ae   : > { %1171 = vmax.xlane.f32.xlu1 %v1170_v25 }
 0x4b0   : > { %1165 = vmax.xlane.f32.xlu0 %v1164_v27 }
 0x4b4   : > { %1168 = vmax.xlane.f32.xlu0 %v1167_v28 }
 0x4b5   : > { %v2956_v30 = vpop.f32.mrb[4].mxu0 }
 0x4b6   : > { %v1317_v31 = vpop.f32.mrb[5].mxu0  ;;  %v1326_v35 = vadd.f32 %v2956_v30, %v3774_v7 }
 0x4b7   : > { %v1318_v32 = vadd.f32 %v1317_v31, %v3774_v7  ;;  %v2957_v33 = vpop.f32.mrb[6].mxu0 }
 0x4b8   : > { %v1320_v34 = vpop.f32.mrb[7].mxu0  ;;  %v1337_v39 = vsel %vm1000_vm5, %v1326_v35, -inf }
 0x4b9   : > { %v1321_v36 = vadd.f32 %v1320_v34, %v3774_v7  ;;  %v1331_v37 = vsel %vm1000_vm5, %v1318_v32, -inf }
 0x4ba   : > { %1332 = vmax.xlane.f32.xlu0 %v1331_v37 }
 0x4bb   : > { %v1334_v38 = vsel %vm1000_vm5, %v1321_v36, -inf }
 0x4bc   : > { %1335 = vmax.xlane.f32.xlu1 %v1334_v38 }
 0x4be   : > { %1338 = vmax.xlane.f32.xlu0 %v1337_v39 }
 0x535   : > { %v1003_v42 = vpop.xlane.xlu0 %1002 }
 0x536   : > { %v1010_v43 = vsub.f32 %v987_v12, %v1003_v42 }
 0x537   : > { %v1006_v44 = vpop.xlane.xlu1 %1005 }
 0x538   : > { %v1013_v48 = vmul.f32 1.442695, %v1010_v43  ;;  %v1011_v53 = vsub.f32 %v990_v18, %v1006_v44 }
 0x539   : > { %v1009_v45 = vpop.xlane.xlu0 %1008 }
 0x53a   : > { %v1012_v47 = vsub.f32 %v995_v17, %v1009_v45  ;;  %v1015_v57 = vmul.f32 1.442695, %v1011_v53 }
 0x53b   : > { %v1172_v49 = vpop.xlane.xlu1 %1171 }
 0x53c   : > { %v1017_v50 = vmul.f32 1.442695, %v1012_v47  ;;  %v1175_v51 = vsub.f32 %v1159_v21, %v1172_v49 }
 0x53d   : > { %v1166_v52 = vpop.xlane.xlu0 %1165 }
 0x53e   : > { %3262 = vpow2.f32 %v1017_v50  ;;  %v1180_v54 = vmul.f32 1.442695, %v1175_v51  ;;  %v1173_v55 = vsub.f32 %v1151_v23, %v1166_v52 }
 0x53f   : > { %3264 = vpow2.f32 %v1013_v48 }
 0x540   : > { %3266 = vpow2.f32 %v1180_v54  ;;  %v1176_v56 = vmul.f32 1.442695, %v1173_v55 }
 0x541   : > { %v1169_v9 = vpop.xlane.xlu0 %1168 }
 0x542   : > { %3268 = vpow2.f32 %v1176_v56  ;;  %v1174_v13 = vsub.f32 %v1154_v26, %v1169_v9 }
 0x543   : > { %3270 = vpow2.f32 %v1015_v57 }
 0x544   : > { %v1178_v16 = vmul.f32 1.442695, %v1174_v13 }
 0x546   : > { %3272 = vpow2.f32 %v1178_v16 }
 0x547   : > { %v1333_v11 = vpop.xlane.xlu0 %1332 }
 0x548   : > { %v3794_v58 = vpop.eup %3262  ;;  %v1340_v19 = vsub.f32 %v1318_v32, %v1333_v11 }
 0x549   : > { %v3796_v59 = vpop.eup %3264  ;;  %v1025_v62 = vsel %vm1000_vm5, %v3794_v58, 0.0  ;;  %v1336_v12 = vpop.xlane.xlu1 %1335 }
 0x54a   : > { %v3800_v63 = vpop.eup %3266  ;;  %1026 = vadd.xlane.f32.xlu1 %v1025_v62  ;;  %v1019_v2 = vsel %vm1000_vm5, %v3796_v59, 0.0  ;;  %v1341_v15 = vsub.f32 %v1321_v36, %v1336_v12  ;;  %v1343_v20 = vmul.f32 1.442695, %v1340_v19 }
 0x54b   : > { %v1188_v0 = vsel %vm1000_vm5, %v3800_v63, 0.0  ;;  %v1339_v14 = vpop.xlane.xlu0 %1338 }
 0x54c   : > { %v3804_v1 = vpop.eup %3268  ;;  %1189 = vadd.xlane.f32.xlu0 %v1188_v0  ;;  %v1342_v17 = vsub.f32 %v1326_v35, %v1339_v14  ;;  %v1345_v18 = vmul.f32 1.442695, %v1341_v15 }
 0x54d   : > { %v1182_v3 = vsel %vm1000_vm5, %v3804_v1, 0.0  ;;  %v3271_v4 = vpop.eup %3270 }
 0x54e   : > { %1020 = vadd.xlane.f32.xlu1 %v1019_v2  ;;  %v1022_v6 = vsel %vm1000_vm5, %v3271_v4, 0.0  ;;  %v1347_v5 = vmul.f32 1.442695, %v1342_v17  ;;  %3274 = vpow2.f32 %v1345_v18 }
 0x550   : > { %1183 = vadd.xlane.f32.xlu0 %v1182_v3  ;;  %3276 = vpow2.f32 %v1347_v5  ;;  %v3273_v21 = vpop.eup %3272 }
 0x551   : > { %3278 = vpow2.f32 %v1343_v20  ;;  %v1185_v23 = vsel %vm1000_vm5, %v3273_v21, 0.0 }
 0x554   : > { %1023 = vadd.xlane.f32.xlu0 %v1022_v6 }
 0x558   : > { %v3817_v22 = vpop.eup %3274 }
 0x559   : > { %v1352_v25 = vsel %vm1000_vm5, %v3817_v22, 0.0 }
 0x55a   : > { %v3820_v24 = vpop.eup %3276 }
 0x55b   : > { %v1355_v26 = vsel %vm1000_vm5, %v3820_v24, 0.0  ;;  %v3826_v27 = vpop.eup %3278 }
 0x55c   : > { %v1349_v28 = vsel %vm1000_vm5, %v3826_v27, 0.0 }
 0x55f   : > { %1203 = vrot.lane.b32.xlu1 %v3758_v60, %s3450_s0 }
 0x563   : > { %1366 = vrot.lane.b32.xlu1 %v3723_v41, %s3451_s18 }
 0x56a   : > { %1201 = vrot.lane.b32.xlu0 %v3723_v41, %s3450_s0 }
 0x587   : > { %1186 = vadd.xlane.f32.xlu1 %v1185_v23 }
 0x589   : > { %1353 = vadd.xlane.f32.xlu0 %v1352_v25 }
 0x58b   : > { %1356 = vadd.xlane.f32.xlu1 %v1355_v26 }
 0x58f   : > { %1350 = vadd.xlane.f32.xlu1 %v1349_v28 }
 0x59f   : > { %1432 = vrot.lane.b32.xlu0 %v3721_v40, %s3454_s26 }
 0x5a0   : > { %1368 = vrot.lane.b32.xlu1 %v3758_v60, %s3451_s18 }
 0x5a3   : > { %1428 = vrot.lane.b32.xlu0 %v3721_v40, %s3455_s13 }
 0x5a4   : > { %1434 = vrot.lane.b32.xlu1 %v3730_v46, %s3454_s26 }
 0x5a8   : > { %1430 = vrot.lane.b32.xlu1 %v3730_v46, %s3455_s13 }
 0x5d7   : > { %v1027_v30 = vpop.xlane.xlu1 %1026 }
 0x5d8   : > { %3280 = vrcp.f32 %v1027_v30 }
 0x5d9   : > { %v1190_v31 = vpop.xlane.xlu0 %1189 }
 0x5db   : > { %v1021_v32 = vpop.xlane.xlu1 %1020 }
 0x5dc   : > { %3282 = vrcp.f32 %v1021_v32 }
 0x5dd   : > { %v1184_v33 = vpop.xlane.xlu0 %1183 }
 0x5df   : > { %v1204_v44 = vpop.permute.xlu1 %1203 }
 0x5e0   : > { %v1213_v45 = vsel %vm1044_vm3, %v1204_v44, 0 }
 0x5e1   : > { %v1024_v34 = vpop.xlane.xlu0 %1023 }
 0x5e2   : > { %3284 = vrcp.f32 %v1024_v34  ;;  %v3281_v36 = vpop.eup %3280 }
 0x5e3   : > { %v1033_v40 = vmul.f32 %v3281_v36, %v3794_v58  ;;  %v1367_v47 = vpop.permute.xlu1 %1366  ;;  %3286 = vrcp.f32 %v1190_v31 }
 0x5e4   : > { %3288 = vrcp.f32 %v1184_v33 }
 0x5e5   : > { %v1202_v35 = vpop.permute.xlu0 %1201  ;;  %v1035_v46 = vpack.c.bf16 %v1033_v40, %v1033_v40 }
 0x5e6   : > { %2942 = vmatprep.subr.bf16.mxu1 %v1202_v35  ;;  %v3283_v37 = vpop.eup %3282 }
 0x5e7   : > { %v1031_v39 = vmul.f32 %v3283_v37, %v3796_v59 }
 0x5ec   : > { %v3285_v38 = vpop.eup %3284 }
 0x5ed   : > { %v1032_v42 = vmul.f32 %v3285_v38, %v3271_v4  ;;  %v3287_v51 = vpop.eup %3286 }
 0x5ee   : > { %v3289_v53 = vpop.eup %3288  ;;  %v1196_v55 = vmul.f32 %v3287_v51, %v3800_v63 }
 0x5ef   : > { %v1034_v43 = vpack.c.bf16 %v1032_v42, %v1031_v39  ;;  %v1194_v56 = vmul.f32 %v3289_v53, %v3804_v1 }
 0x5f0   : > { %v1198_v59 = vpack.c.bf16 %v1196_v55, %v1196_v55 }
 0x5f1   : > { %2930 = vmatprep.mubr.msk.bf16.mxu1 %vm1000_vm5, %v1034_v43 }
 0x5f2   : > { %2931 = vmatmul.mubr.msk.bf16.vlgmr.msra.gmra.mrb[12].mxu1 %vm1000_vm5, %v1035_v46 }
 0x5f3   : > { %2943 = vmatpush3.bf16.msra.mxu1 %v1202_v35 }
 0x5f4   : > { %3089 = vmatprep.subr.msk.bf16.mxu1 %vm1044_vm3, %v1204_v44 }
 0x5f7   : > { %2945 = vmatpush3.bf16.msra.mxu1 %v1213_v45 }
 0x5f8   : > { %2958 = vmatprep.subr.bf16.mxu1 %v1367_v47 }
 0x614   : > { %v1187_v48 = vpop.xlane.xlu1 %1186 }
 0x615   : > { %3290 = vrcp.f32 %v1187_v48 }
 0x616   : > { %v1354_v49 = vpop.xlane.xlu0 %1353 }
 0x618   : > { %v1357_v50 = vpop.xlane.xlu1 %1356 }
 0x619   : > { %3292 = vrcp.f32 %v1357_v50 }
 0x61a   : > { %3294 = vrcp.f32 %v1354_v49  ;;  %v1433_v6 = vpop.permute.xlu0 %1432 }
 0x61b   : > { %v1443_v14 = vsel %vm939_vm2, %v1433_v6, 0 }
 0x61c   : > { %v1351_v52 = vpop.xlane.xlu1 %1350 }
 0x61d   : > { %3296 = vrcp.f32 %v1351_v52 }
 0x61e   : > { %v1429_v13 = vpop.permute.xlu0 %1428 }
 0x61f   : > { %v3291_v54 = vpop.eup %3290 }
 0x620   : > { %v1195_v57 = vmul.f32 %v3291_v54, %v3273_v21  ;;  %v1369_v2 = vpop.permute.xlu1 %1368 }
 0x621   : > { %v1378_v9 = vsel %vm1044_vm3, %v1369_v2, 0 }
 0x622   : > { %v1197_v58 = vpack.c.bf16 %v1195_v57, %v1194_v56 }
 0x623   : > { %v3293_v62 = vpop.eup %3292 }
 0x624   : > { %2946 = vmatprep.mubr.msk.bf16.mxu1 %vm1000_vm5, %v1197_v58  ;;  %v3295_v0 = vpop.eup %3294  ;;  %v1363_v4 = vmul.f32 %v3293_v62, %v3820_v24  ;;  %v1435_v15 = vpop.permute.xlu1 %1434 }
 0x625   : > { %2947 = vmatmul.mubr.msk.bf16.vlgmr.msra.gmra.mrb[16].mxu1 %vm1000_vm5, %v1198_v59  ;;  %v1362_v1 = vmul.f32 %v3295_v0, %v3817_v22  ;;  %v1446_v16 = vsel %vm939_vm2, %v1435_v15, 0 }
 0x626   : > { %2959 = vmatpush3.bf16.msra.mxu1 %v1367_v47  ;;  %v1365_v12 = vpack.c.bf16 %v1363_v4, %v1363_v4 }
 0x627   : > { %v3297_v3 = vpop.eup %3296  ;;  %3092 = vmatprep.subr.msk.bf16.mxu1 %vm1044_vm3, %v1369_v2 }
 0x628   : > { %v1361_v63 = vmul.f32 %v3297_v3, %v3826_v27  ;;  %v1431_v17 = vpop.permute.xlu1 %1430 }
 0x62a   : > { %2961 = vmatpush3.bf16.msra.mxu1 %v1378_v9  ;;  %v1364_v11 = vpack.c.bf16 %v1362_v1, %v1361_v63 }
 0x62b   : > { %3093 = vmatprep.subr.msk.bf16.mxu1 %vm939_vm2, %v1433_v6 }
 0x62c   : > { %2962 = vmatprep.mubr.msk.bf16.mxu1 %vm1000_vm5, %v1364_v11  ;;  %v3224_v11 = vld [vmem:[%s3620_s25] sm:$0xff]  }
 0x62d   : > { %2963 = vmatmul.mubr.msk.bf16.vlgmr.msra.gmra.mrb[20].mxu1 %vm1000_vm5, %v1365_v12  ;;  %v3225_v12 = vld [vmem:[%s3620_s25 + $0x8] sm:$0xff]  }
 0x62e   : > { %2970 = vmatprep.mubr.msk.bf16.mxu1 %vm939_vm2, %v1429_v13  ;;  %v3226_v13 = vld [vmem:[%s3620_s25 + $0x10] sm:$0xff]  }
 0x633   : > { %2967 = vmatpush3.bf16.xpose.msra.mxu1 %v1443_v14  ;;  %v3227_v14 = vld [vmem:[%s3620_s25 + $0x18] sm:$0xff]  }
 0x634   : > { %3094 = vmatprep.subr.msk.bf16.mxu1 %vm939_vm2, %v1435_v15 }
 0x63b   : > { %2969 = vmatpush3.bf16.xpose.msra.mxu1 %v1446_v16 }
 0x642   : > { %2971 = vmatmul.mubr.msk.bf16.vlgmr.msra.gmra.mrb[24].mxu1 %vm939_vm2, %v1431_v17 }
 0x643   : > { %1871 = vmatprep.mubr.bf16.mxu1 %v3447_v61 }
 0x6c5   : > { %v3864_v18 = vpop.f32.mrb[12].mxu1 }
 0x6c6   : > { %v3866_v19 = vpop.f32.mrb[13].mxu1 }
 0x6c7   : > { %v2933_v5 = vpop.f32.mrb[14].mxu1 }
 0x6c8   : > { %v3868_v20 = vpop.f32.mrb[15].mxu1 }
 0x6f8   : > { %v2948_v21 = vpop.f32.mrb[16].mxu1 }
 0x6f9   : > { %v1249_v22 = vpop.f32.mrb[17].mxu1 }
 0x6fa   : > { %v2949_v23 = vpop.f32.mrb[18].mxu1 }
 0x6fb   : > { %v1252_v24 = vpop.f32.mrb[19].mxu1 }
 0x6fc   : > { %v3197_v25 = vpack.i.bf16 %v1252_v24, %v1249_v22 }
 0x700   : > { %v2964_v26 = vpop.f32.mrb[20].mxu1 }
 0x701   : > { %v1414_v27 = vpop.f32.mrb[21].mxu1 }
 0x702   : > { %v2965_v28 = vpop.f32.mrb[22].mxu1 }
 0x703   : > { %v1417_v30 = vpop.f32.mrb[23].mxu1 }
 0x704   : > { %v3202_v31 = vpack.i.bf16 %v1417_v30, %v1414_v27 }
 0x715   : > { %v2972_v32 = vpop.f32.mrb[24].mxu1 }
 0x716   : > { %v1482_v33 = vpop.f32.mrb[25].mxu1  ;;  %v1491_v37 = vadd.f32 %v2972_v32, %v3774_v7 }
 0x717   : > { %v1483_v34 = vadd.f32 %v1482_v33, %v3774_v7  ;;  %v2973_v35 = vpop.f32.mrb[26].mxu1 }
 0x718   : > { %v1485_v36 = vpop.f32.mrb[27].mxu1  ;;  %v1502_v42 = vsel %vm1000_vm5, %v1491_v37, -inf }
 0x719   : > { %v1486_v38 = vadd.f32 %v1485_v36, %v3774_v7  ;;  %v1496_v40 = vsel %vm1000_vm5, %v1483_v34, -inf }
 0x71a   : > { %1497 = vmax.xlane.f32.xlu0 %v1496_v40 }
 0x71b   : > { %v1499_v39 = vsel %vm1000_vm5, %v1486_v38, -inf }
 0x71c   : > { %1500 = vmax.xlane.f32.xlu1 %v1499_v39 }
 0x71e   : > { %1503 = vmax.xlane.f32.xlu0 %v1502_v42 }
 0x7a7   : > { %v1498_v43 = vpop.xlane.xlu0 %1497 }
 0x7a8   : > { %v1505_v46 = vsub.f32 %v1483_v34, %v1498_v43 }
 0x7a9   : > { %v1501_v44 = vpop.xlane.xlu1 %1500 }
 0x7aa   : > { %v1508_v45 = vmul.f32 1.442695, %v1505_v46  ;;  %v1506_v47 = vsub.f32 %v1486_v38, %v1501_v44 }
 0x7ab   : > { %v1504_v48 = vpop.xlane.xlu0 %1503 }
 0x7ac   : > { %3298 = vpow2.f32 %v1508_v45  ;;  %v1510_v49 = vmul.f32 1.442695, %v1506_v47  ;;  %v1507_v50 = vsub.f32 %v1491_v37, %v1504_v48  ;;  %v3328_v48 = vld [vmem:[#allocation2 + $0x10] sm:$0xff] }
 0x7ae   : > { %3300 = vpow2.f32 %v1510_v49  ;;  %v1512_v7 = vmul.f32 1.442695, %v1507_v50  ;;  %v3329_v50 = vld [vmem:[#allocation2] sm:$0xff] }
 0x7b0   : > { %3302 = vpow2.f32 %v1512_v7 }
 0x7b6   : > { %v3299_v51 = vpop.eup %3298 }
 0x7b7   : > { %v1514_v52 = vsel %vm1000_vm5, %v3299_v51, 0.0 }
 0x7b8   : > { %v3301_v53 = vpop.eup %3300  ;;  %1515 = vadd.xlane.f32.xlu0 %v1514_v52 }
 0x7b9   : > { %v1517_v55 = vsel %vm1000_vm5, %v3301_v53, 0.0 }
 0x7ba   : > { %v3303_v54 = vpop.eup %3302 }
 0x7bb   : > { %v1520_v56 = vsel %vm1000_vm5, %v3303_v54, 0.0 }
 0x7bc   : > { %1518 = vadd.xlane.f32.xlu0 %v1517_v55  ;;  %1521 = vadd.xlane.f32.xlu1 %v1520_v56 }
 0x7cd   : > { %1533 = vrot.lane.b32.xlu1 %v3758_v60, %s3455_s13 }
 0x7d1   : > { %3198 = vrot.lane.b32.xlu1 %v3197_v25, %s3454_s26 }
 0x7d2   : > { %1531 = vrot.lane.b32.xlu0 %v3723_v41, %s3455_s13 }
 0x7d5   : > { %1600 = vrot.lane.b32.xlu1 %v2948_v21, %s3454_s26  ;;  %s4170_s26 = sld [smem:[#allocation19_spill]] (!%p2780_p1) }
 0x7d6   : > { %3203 = vrot.lane.b32.xlu0 %v3202_v31, %s3452_s30 }
 0x7d9   : > { %1612 = vrot.lane.b32.xlu1 %v2964_v26, %s3452_s30 }
 0x845   : > { %v1516_v57 = vpop.xlane.xlu0 %1515 }
 0x846   : > { %3304 = vrcp.f32 %v1516_v57 }
 0x849   : > { %v1522_v58 = vpop.xlane.xlu1 %1521  ;;  %v1519_v59 = vpop.xlane.xlu0 %1518 }
 0x84a   : > { %3306 = vrcp.f32 %v1522_v58 }
 0x84b   : > { %3308 = vrcp.f32 %v1519_v59 }
 0x84d   : > { %v1532_v62 = vpop.permute.xlu0 %1531  ;;  %v1534_v60 = vpop.permute.xlu1 %1533 }
 0x84e   : > { %2974 = vmatprep.subr.bf16.mxu0 %v1532_v62  ;;  %v1543_v41 = vsel %vm1044_vm3, %v1534_v60, 0 }
 0x84f   : > { %2975 = vmatpush3.bf16.msra.mxu0 %v1532_v62 }
 0x850   : > { %3095 = vmatprep.subr.msk.bf16.mxu0 %vm1044_vm3, %v1534_v60  ;;  %v3305_v0 = vpop.eup %3304 }
 0x851   : > { %v1526_v6 = vmul.f32 %v3305_v0, %v3299_v51  ;;  %v3199_v22 = vpop.permute.xlu1 %3198  ;;  %v3204_v26 = vpop.permute.xlu0 %3203 }
 0x852   : > { %v3201_v24 = vunpack.i.h.bf16 %v3199_v22  ;;  %v3200_v25 = vunpack.i.l.bf16 %v3199_v22  ;;  %v3206_v28 = vunpack.i.h.bf16 %v3204_v26  ;;  %v3205_v30 = vunpack.i.l.bf16 %v3204_v26  ;;  %v3236_v22 = vld [vmem:[%s3625_s27 + $0x24] ss:$8 sps:$4 sm:$0xff]  }
 0x853   : > { %2977 = vmatpush3.bf16.msra.mxu0 %v1543_v41 }
 0x854   : > { %v3307_v2 = vpop.eup %3306  ;;  %2982 = vmatprep.subr.bf16.mxu0 %v3224_v11  ;;  %v1630_v31 = vsel %vm939_vm2, %v3868_v20, %v3201_v24  ;;  %v1629_v32 = vsel %vm939_vm2, %v3866_v19, %v3200_v25  ;;  %v1725_v19 = vsub.s32 3, %v3703_v8  ;;  %v3237_v24 = vld [vmem:[%s3625_s27 + $0x30] ss:$8 sps:$4 sm:$0xff]   ;;  %v3239_v25 = vld [vmem:[%s3625_s27 + $0x34] ss:$8 sps:$4 sm:$0xff]  }
 0x855   : > { %v3309_v3 = vpop.eup %3308  ;;  %v1528_v4 = vmul.f32 %v3307_v2, %v3303_v54  ;;  %v1601_v23 = vpop.permute.xlu1 %1600  ;;  %v1633_v40 = vsel %vm1632_vm6, %v1629_v32, %v3205_v30  ;;  %v1634_v39 = vsel %vm1632_vm6, %v1630_v31, %v3206_v28  ;;  %v3330_v54 = vld [vmem:[#allocation2 + $0x8] sm:$0xff] }
 0x856   : > { %v1527_v63 = vmul.f32 %v3309_v3, %v3301_v53  ;;  %v1631_v34 = vsel %vm939_vm2, %v3864_v18, %v1601_v23  ;;  %v1726_v18 = vrot.slane %v3707_v10, %v1725_v19  ;;  %v3234_v23 = vld [vmem:[%s3625_s27 + $0x20] ss:$8 sps:$4 sm:$0xff]  }
 0x857   : > { %v1530_v1 = vpack.c.bf16 %v1528_v4, %v1528_v4 }
 0x858   : > { %v1529_v9 = vpack.c.bf16 %v1527_v63, %v1526_v6 }
 0x859   : > { %v1613_v27 = vpop.permute.xlu1 %1612 }
 0x85a   : > { %2978 = vmatprep.mubr.msk.bf16.mxu0 %vm1000_vm5, %v1529_v9  ;;  %v1635_v36 = vsel %vm1632_vm6, %v1631_v34, %v1613_v27 }
 0x85b   : > { %2979 = vmatmul.mubr.msk.bf16.vlgmr.msra.gmra.mrb[8].mxu0 %vm1000_vm5, %v1530_v1 }
 0x85c   : > { %2983 = vmatpush3.bf16.msra.mxu0 %v3224_v11 }
 0x85d   : > { %2984 = vmatprep.subr.bf16.mxu0 %v3225_v12 }
 0x860   : > { %2985 = vmatpush3.bf16.msra.mxu0 %v3225_v12 }
 0x861   : > { %2986 = vmatprep.subr.bf16.mxu0 %v3226_v13 }
 0x864   : > { %2987 = vmatpush3.bf16.msra.mxu0 %v3226_v13 }
 0x865   : > { %2988 = vmatprep.subr.bf16.mxu0 %v3227_v14 }
 0x868   : > { %2989 = vmatpush3.bf16.msra.mxu0 %v3227_v14 }
 0x92e   : > { %v2980_v15 = vpop.f32.mrb[8].mxu0 }
 0x92f   : > { %1624 = vrot.lane.b32.xlu1 %v2980_v15, %s3448_s12  ;;  %v1579_v16 = vpop.f32.mrb[9].mxu0 }
 0x930   : > { %v2981_v17 = vpop.f32.mrb[10].mxu0 }
 0x931   : > { %v1582_v5 = vpop.f32.mrb[11].mxu0  ;;  %v3228_v17 = vld [vmem:[%s3625_s27] ss:$8 sps:$4 sm:$0xff]  }
 0x932   : > { %v3207_v21 = vpack.i.bf16 %v1582_v5, %v1579_v16  ;;  %v3230_v16 = vld [vmem:[%s3625_s27 + $0x4] ss:$8 sps:$4 sm:$0xff]   ;;  %v3233_v5 = vld [vmem:[%s3625_s27 + $0x14] ss:$8 sps:$4 sm:$0xff]  }
 0x933   : > { %1839 = vmatprep.subr.bf16.mxu1 %v3230_v16 }
 0x934   : > { %3208 = vrot.lane.b32.xlu0 %v3207_v21, %s3448_s12  ;;  %1840 = vmatpush1.bf16.msra.mxu1 %v3228_v17  ;;  %v3231_v21 = vld [vmem:[%s3625_s27 + $0x10] ss:$8 sps:$4 sm:$0xff]  }
 0x935   : > { %1841 = vmatprep.subr.bf16.mxu1 %v3233_v5 }
 0x938   : > { %1842 = vmatpush1.bf16.msra.mxu1 %v3231_v21 }
 0x939   : > { %1843 = vmatprep.subr.bf16.mxu1 %v3236_v22 }
 0x93c   : > { %1844 = vmatpush1.bf16.msra.mxu1 %v3234_v23 }
 0x93d   : > { %1845 = vmatprep.subr.bf16.mxu1 %v3239_v25 }
 0x940   : > { %1846 = vmatpush1.bf16.msra.mxu1 %v3237_v24 }
 0x9a1   : > { %v1625_v33 = vpop.permute.xlu1 %1624 }
 0x9a2   : > { %v1639_v42 = vsel %vm1636_vm7, %v1635_v36, %v1625_v33  ;;  %v1771_v36 = vsub.s32 4, %v3703_v8 }
 0x9a3   : > { %v1641_v20 = vpack.c.bf16 %v1639_v42, %v1639_v42 }
 0x9a6   : > { %v3209_v35 = vpop.permute.xlu0 %3208 }
 0x9a7   : > { %v3211_v37 = vunpack.i.h.bf16 %v3209_v35  ;;  %v3210_v38 = vunpack.i.l.bf16 %v3209_v35 }
 0x9a9   : > { %v1637_v43 = vsel %vm1636_vm7, %v1633_v40, %v3210_v38  ;;  %v1638_v46 = vsel %vm1636_vm7, %v1634_v39, %v3211_v37  ;;  %v1772_v38 = vrot.slane %v3707_v10, %v1771_v36  ;;  %v1778_v39 = vsub.s32 5, %v3703_v8 }
 0x9aa   : > { %v1640_v44 = vpack.c.bf16 %v1638_v46, %v1637_v43 }
 0x9ac   : > { %2990 = vmatprep.mubr.msk.bf16.mxu0 %vm769_vm1, %v1640_v44 }
 0x9ad   : > { %2991 = vmatmul.mubr.msk.bf16.vlgmr.msra.gmra.mrb[12].mxu0 %vm769_vm1, %v1641_v20  ;;  %v1779_v20 = vrot.slane %v3707_v10, %v1778_v39  ;;  %v3240_v10 = vld [vmem:[%s3630_s17 + $0x40] sm:$0xff]  }
 0x9ae   : > { %2866 = vmatprep.subr.bf16.mxu0 %v3240_v10 }
 0xa80   : > { %v2992_v45 = vpop.f32.mrb[12].mxu0 }
 0xa81   : > { %v1706_v47 = vpop.f32.mrb[13].mxu0  ;;  %v1722_v49 = vadd.f32 %v3328_v48, %v2992_v45 }
 0xa82   : > { %v1720_v7 = vadd.f32 %v3329_v50, %v1706_v47  ;;  %v2993_v51 = vpop.f32.mrb[14].mxu0 }
 0xa83   : > { %v1709_v52 = vpop.f32.mrb[15].mxu0  ;;  %v3909_v56 = vadd.f32 %v1726_v18, %v1722_v49  ;;  %v3241_v51 = vld [vmem:[%s3630_s17] sm:$0xff]  }
 0xa84   : > { %v3907_v53 = vadd.f32 %v1726_v18, %v1720_v7  ;;  %v1721_v55 = vadd.f32 %v3330_v54, %v1709_v52  ;;  %2867 = vmatpush3.bf16.msra.mxu0 %v3241_v51  ;;  %v3242_v52 = vld [vmem:[%s3630_s17 + $0x48] sm:$0xff]  }
 0xa85   : > { %v1736_v62 = vsel %vm769_vm1, %v3909_v56, 0.0  ;;  %v3243_v54 = vld [vmem:[%s3630_s17 + $0x8] sm:$0xff]   ;;  %2868 = vmatprep.subr.bf16.mxu0 %v3242_v52 }
 0xa86   : > { %v3911_v57 = vadd.f32 %v1726_v18, %v1721_v55  ;;  %v1730_v58 = vsel %vm769_vm1, %v3907_v53, 0.0  ;;  %v3244_v55 = vld [vmem:[%s3630_s17 + $0x50] sm:$0xff]  }
 0xa87   : > { %1731 = vadd.xlane.f32.xlu0 %v1730_v58  ;;  %v3246_v58 = vld [vmem:[%s3630_s17 + $0x58] sm:$0xff]  }
 0xa88   : > { %v1733_v59 = vsel %vm769_vm1, %v3911_v57, 0.0  ;;  %2869 = vmatpush3.bf16.msra.mxu0 %v3243_v54 }
 0xa89   : > { %1734 = vadd.xlane.f32.xlu1 %v1733_v59  ;;  %2870 = vmatprep.subr.bf16.mxu0 %v3244_v55  ;;  %v3247_v59 = vld [vmem:[%s3630_s17 + $0x18] sm:$0xff]  }
 0xa8b   : > { %1737 = vadd.xlane.f32.xlu0 %v1736_v62  ;;  %v3248_v62 = vld [vmem:[%s3630_s17 + $0x60] sm:$0xff]  }
 0xb14   : > { %v1732_v60 = vpop.xlane.xlu0 %1731 }
 0xb15   : > { %v1739_v41 = vmul.f32 0.015625, %v1732_v60  ;;  %v3249_v60 = vld [vmem:[%s3630_s17 + $0x20] sm:$0xff]  }
 0xb16   : > { %v1735_v0 = vpop.xlane.xlu1 %1734 }
 0xb17   : > { %v1742_v2 = vsub.f32 %v3907_v53, %v1739_v41  ;;  %v1740_v3 = vmul.f32 0.015625, %v1735_v0  ;;  %v3250_v41 = vld [vmem:[%s3630_s17 + $0x68] sm:$0xff]  }
 0xb18   : > { %v1738_v4 = vpop.xlane.xlu0 %1737  ;;  %v3251_v0 = vld [vmem:[%s3630_s17 + $0x28] sm:$0xff]  }
 0xb19   : > { %v1743_v6 = vsub.f32 %v3911_v57, %v1740_v3  ;;  %v1741_v63 = vmul.f32 0.015625, %v1738_v4  ;;  %v1745_v1 = vmul.f32 %v1742_v2, %v1742_v2  ;;  %v3253_v3 = vld [vmem:[%s3630_s17 + $0x30] sm:$0xff]   ;;  %v3254_v4 = vld [vmem:[%s3630_s17 + $0x78] sm:$0xff]  }
 0xb1b   : > { %v1744_v9 = vsub.f32 %v3909_v56, %v1741_v63  ;;  %v1748_v11 = vsel %vm769_vm1, %v1745_v1, 0.0  ;;  %v1746_v12 = vmul.f32 %v1743_v6, %v1743_v6  ;;  %v1787_v63 = vsub.s32 6, %v3703_v8  ;;  %v3958_v1 = vld [vmem:[%s3610_s21] sm:$0xff] }
 0xb1c   : > { %1749 = vadd.xlane.f32.xlu0 %v1748_v11 }
 0xb1d   : > { %v1747_v13 = vmul.f32 %v1744_v9, %v1744_v9  ;;  %v1751_v15 = vsel %vm769_vm1, %v1746_v12, 0.0  ;;  %v1792_v11 = vrot.slane %v3717_v29, %v1787_v63 }
 0xb1f   : > { %v1754_v14 = vsel %vm769_vm1, %v1747_v13, 0.0 }
 0xb20   : > { %1755 = vadd.xlane.f32.xlu1 %v1754_v14  ;;  %1752 = vadd.xlane.f32.xlu0 %v1751_v15 }
 0xba9   : > { %v1750_v26 = vpop.xlane.xlu0 %1749 }
 0xbaa   : > { %v1757_v27 = vmul.f32 0.015625, %v1750_v26 }
 0xbac   : > { %v1760_v28 = vadd.f32 1e-06, %v1757_v27 }
 0xbad   : > { %v1753_v30 = vpop.xlane.xlu0 %1752  ;;  %v1756_v31 = vpop.xlane.xlu1 %1755 }
 0xbae   : > { %3310 = vrsqrt.f32 %v1760_v28  ;;  %v1758_v32 = vmul.f32 0.015625, %v1753_v30  ;;  %v1759_v33 = vmul.f32 0.015625, %v1756_v31 }
 0xbb0   : > { %v1761_v34 = vadd.f32 1e-06, %v1758_v32  ;;  %v1762_v35 = vadd.f32 1e-06, %v1759_v33 }
 0xbb2   : > { %3312 = vrsqrt.f32 %v1761_v34 }
 0xbb3   : > { %3314 = vrsqrt.f32 %v1762_v35 }
 0xbb8   : > { %v3311_v37 = vpop.eup %3310 }
 0xbb9   : > { %v1766_v40 = vmul.f32 %v3311_v37, %v1742_v2  ;;  %v3252_v2 = vld [vmem:[%s3630_s17 + $0x70] sm:$0xff]  }
 0xbbb   : > { %v1773_v46 = vmul.f32 %v1772_v38, %v1766_v40 }
 0xbbc   : > { %v3313_v42 = vpop.eup %3312 }
 0xbbd   : > { %v3315_v43 = vpop.eup %3314  ;;  %v1767_v44 = vmul.f32 %v3313_v42, %v1743_v6  ;;  %v1780_v18 = vadd.f32 %v1779_v20, %v1773_v46  ;;  %v3255_v6 = vld [vmem:[%s3630_s17 + $0x38] sm:$0xff]  }
 0xbbe   : > { %v1768_v45 = vmul.f32 %v3315_v43, %v1744_v9  ;;  %v1788_v9 = vrot.slane %v3958_v1, %v1787_v63 }
 0xbbf   : > { %v1774_v19 = vmul.f32 %v1772_v38, %v1767_v44 }
 0xbc0   : > { %v1775_v49 = vmul.f32 %v1772_v38, %v1768_v45 }
 0xbc1   : > { %v1781_v47 = vadd.f32 %v1779_v20, %v1774_v19 }
 0xbc2   : > { %v1782_v50 = vadd.f32 %v1779_v20, %v1775_v49 }
 0xbc3   : > { %v1783_v48 = vpack.c.bf16 %v1781_v47, %v1780_v18 }
 0xbc4   : > { %v1784_v7 = vpack.c.bf16 %v1782_v50, %v1782_v50 }
 0xbc5   : > { %2762 = vmatmul.mubr.msk.bf16.vlgmr.msra.gmra.mrb[28].mxu1 %vm769_vm1, %v1783_v48 }
 0xbc6   : > { %1881 = vmatprep.mubr.bf16.mxu1 %v3447_v61  ;;  %v3245_v61 = vld [vmem:[%s3630_s17 + $0x10] sm:$0xff]  }
 0xbc7   : > { %2871 = vmatpush3.bf16.msra.mxu0 %v3245_v61 }
 0xbc8   : > { %2872 = vmatprep.subr.bf16.mxu0 %v3246_v58 }
 0xbcb   : > { %2873 = vmatpush3.bf16.msra.mxu0 %v3247_v59 }
 0xbcc   : > { %2874 = vmatprep.subr.bf16.mxu0 %v3248_v62 }
 0xbcd   : > { %2763 = vmatmul.mubr.msk.bf16.gmra.mrb[32].mxu1 %vm769_vm1, %v1784_v7 }
 0xbcf   : > { %2875 = vmatpush3.bf16.msra.mxu0 %v3249_v60 }
 0xbd0   : > { %2876 = vmatprep.subr.bf16.mxu0 %v3250_v41 }
 0xbd3   : > { %2877 = vmatpush3.bf16.msra.mxu0 %v3251_v0 }
 0xbd4   : > { %2878 = vmatprep.subr.bf16.mxu0 %v3252_v2 }
 0xbd7   : > { %2879 = vmatpush3.bf16.msra.mxu0 %v3253_v3 }
 0xbd8   : > { %2880 = vmatprep.subr.bf16.mxu0 %v3254_v4 }
 0xbdb   : > { %2881 = vmatpush3.bf16.msra.mxu0 %v3255_v6 }
 0xc98   : > { %v1873_v12 = vpop.f32.mrb[28].mxu1 }
 0xc99   : > { %v1874_v13 = vadd.f32 %v1873_v12, %v1788_v9  ;;  %v1875_v14 = vpop.f32.mrb[29].mxu1 }
 0xc9a   : > { %v1876_v15 = vadd.f32 %v1875_v14, %v1792_v11  ;;  %v1877_v16 = vpop.f32.mrb[30].mxu1 }
 0xc9b   : > { %v1890_v17 = vmul.f32 %v1874_v13, %v1874_v13  ;;  %v1878_v5 = vadd.f32 %v1877_v16, %v1788_v9  ;;  %v1879_v21 = vpop.f32.mrb[31].mxu1 }
 0xc9c   : > { %v1891_v22 = vmul.f32 %v1876_v15, %v1876_v15  ;;  %v1880_v23 = vadd.f32 %v1879_v21, %v1792_v11 }
 0xc9d   : > { %v1896_v24 = vmul.f32 %v1890_v17, %v1874_v13  ;;  %v1892_v25 = vmul.f32 %v1878_v5, %v1878_v5 }
 0xc9e   : > { %v1897_v26 = vmul.f32 %v1891_v22, %v1876_v15  ;;  %v1893_v27 = vmul.f32 %v1880_v23, %v1880_v23 }
 0xc9f   : > { %v1902_v28 = vmul.f32 0.044715, %v1896_v24  ;;  %v1898_v30 = vmul.f32 %v1892_v25, %v1878_v5 }
 0xca0   : > { %v1903_v31 = vmul.f32 0.044715, %v1897_v26  ;;  %v1899_v32 = vmul.f32 %v1893_v27, %v1880_v23  ;;  %v1883_v33 = vpop.f32.mrb[32].mxu1 }
 0xca1   : > { %v1908_v29 = vadd.f32 %v1902_v28, %v1874_v13  ;;  %v1904_v34 = vmul.f32 0.044715, %v1898_v30  ;;  %v1884_v35 = vadd.f32 %v1883_v33, %v1788_v9  ;;  %v1885_v36 = vpop.f32.mrb[33].mxu1 }
 0xca2   : > { %v1909_v37 = vadd.f32 %v1903_v31, %v1876_v15  ;;  %v1905_v38 = vmul.f32 0.044715, %v1899_v32  ;;  %v1886_v40 = vadd.f32 %v1885_v36, %v1792_v11  ;;  %v1887_v39 = vpop.f32.mrb[34].mxu1 }
 0xca3   : > { %v1914_v42 = vmul.f32 0.7978846, %v1908_v29  ;;  %v1910_v43 = vadd.f32 %v1904_v34, %v1878_v5  ;;  %v1894_v46 = vmul.f32 %v1884_v35, %v1884_v35  ;;  %v1888_v44 = vpop.f32.mrb[35].mxu1 }
 0xca4   : > { %v1915_v20 = vmul.f32 0.7978846, %v1909_v37  ;;  %v1911_v19 = vadd.f32 %v1905_v38, %v1880_v23  ;;  %v1895_v45 = vmul.f32 %v1886_v40, %v1886_v40 }
 0xca5   : > { %3316 = vtanh.f32 %v1914_v42  ;;  %v1916_v18 = vmul.f32 0.7978846, %v1910_v43  ;;  %v1900_v47 = vmul.f32 %v1894_v46, %v1884_v35 }
 0xca6   : > { %3318 = vtanh.f32 %v1915_v20  ;;  %v1917_v48 = vmul.f32 0.7978846, %v1911_v19  ;;  %v1901_v49 = vmul.f32 %v1895_v45, %v1886_v40 }
 0xca7   : > { %3320 = vtanh.f32 %v1916_v18  ;;  %v1906_v50 = vmul.f32 0.044715, %v1900_v47 }
 0xca8   : > { %3322 = vtanh.f32 %v1917_v48  ;;  %v1907_v7 = vmul.f32 0.044715, %v1901_v49 }
 0xca9   : > { %v1912_v10 = vadd.f32 %v1906_v50, %v1884_v35 }
 0xcaa   : > { %v1913_v51 = vadd.f32 %v1907_v7, %v1886_v40 }
 0xcab   : > { %v1918_v52 = vmul.f32 0.7978846, %v1912_v10 }
 0xcac   : > { %v1919_v54 = vmul.f32 0.7978846, %v1913_v51 }
 0xcad   : > { %3324 = vtanh.f32 %v1918_v52 }
 0xcae   : > { %3326 = vtanh.f32 %v1919_v54 }
 0xcaf   : > { %v3317_v55 = vpop.eup %3316 }
 0xcb0   : > { %v3319_v61 = vpop.eup %3318  ;;  %v1926_v58 = vadd.f32 1.0, %v3317_v55 }
 0xcb1   : > { %v3321_v59 = vpop.eup %3320  ;;  %v1927_v62 = vadd.f32 1.0, %v3319_v61 }
 0xcb2   : > { %v3323_v60 = vpop.eup %3322  ;;  %v1932_v41 = vmul.f32 0.5, %v1926_v58  ;;  %v1928_v0 = vadd.f32 1.0, %v3321_v59 }
 0xcb3   : > { %v1929_v2 = vadd.f32 1.0, %v3323_v60  ;;  %v1933_v3 = vmul.f32 0.5, %v1927_v62  ;;  %v3456_v62 = vmov (!%p2780_p1), 0.0  }
 0xcb4   : > { %v1934_v4 = vmul.f32 0.5, %v1928_v0  ;;  %v1938_v63 = vmul.f32 %v1932_v41, %v1874_v13  ;;  %v2097_v13 = vsub.s32 7, %v3703_v8  ;;  %2994 = vmatprep.subr.bf16.mxu0 (!%p2780_p1), %v3456_v62  ;;  %3022 = vmatprep.subr.bf16.mxu1 (!%p2780_p1), %v3456_v62 }
 0xcb5   : > { %v1935_v6 = vmul.f32 0.5, %v1929_v2  ;;  %v1939_v12 = vmul.f32 %v1933_v3, %v1876_v15  ;;  %3030 = vmatprep.mubr.msk.bf16.mxu1 (!%p2780_p1), %vm3457_vm8, %v3456_v62 }
 0xcb6   : > { %v1940_v9 = vmul.f32 %v1934_v4, %v1878_v5  ;;  %v2098_v32 = vrot.slane %v3958_v1, %v2097_v13 }
 0xcb7   : > { %v3325_v11 = vpop.eup %3324  ;;  %v1941_v14 = vmul.f32 %v1935_v6, %v1880_v23 }
 0xcb8   : > { %v3327_v16 = vpop.eup %3326  ;;  %v1944_v17 = vpack.c.bf16 %v1940_v9, %v1938_v63  ;;  %v1930_v21 = vadd.f32 1.0, %v3325_v11 }
 0xcb9   : > { %v1945_v22 = vpack.c.bf16 %v1941_v14, %v1939_v12  ;;  %v1931_v24 = vadd.f32 1.0, %v3327_v16  ;;  %v2781_v14 = vld [vmem:[%s4133_s8] ss:$0 sm:$0xff] (!%p2780_p1) }
 0xcba   : > { %v1936_v25 = vmul.f32 0.5, %v1930_v21 }
 0xcbb   : > { %2076 = vmatprep.mubr.bf16.mxu0 %v1945_v22  ;;  %v1937_v26 = vmul.f32 0.5, %v1931_v24 }
 0xcbc   : > { %2077 = vmatmul.mubr.bf16.vlgmr.msra.gmra.mrb[16].mxu0 %v1944_v17  ;;  %v1942_v28 = vmul.f32 %v1936_v25, %v1884_v35  ;;  %v2782_v25 = vld [vmem:[%s4133_s8 + $0x1] ss:$0 sm:$0xff] (!%p2780_p1) }
 0xcbd   : > { %v1943_v27 = vmul.f32 %v1937_v26, %v1886_v40 }
 0xcbe   : > { %v1946_v31 = vpack.c.bf16 %v1942_v28, %v1942_v28 }
 0xcbf   : > { %v1947_v30 = vpack.c.bf16 %v1943_v27, %v1943_v27 }
 0xcc1   : > { %2084 = vmatprep.mubr.bf16.mxu0 %v1947_v30 }
 0xcc4   : > { %2085 = vmatmul.mubr.bf16.gmra.mrb[20].mxu0 %v1946_v31 }
 0xcc5   : > { %2998 = vmatprep.mubr.msk.bf16.mxu0 (!%p2780_p1), %vm3457_vm8, %v3456_v62 }
 0xd8f   : > { %v2882_v5 = vpop.f32.mrb[16].mxu0 }
 0xd90   : > { %v2883_v15 = vpop.f32.mrb[17].mxu0 }
 0xd91   : > { %v2884_v23 = vadd.f32 %v2883_v15, %v2882_v5  ;;  %v2885_v33 = vpop.f32.mrb[18].mxu0 }
 0xd92   : > { %v2886_v29 = vpop.f32.mrb[19].mxu0 }
 0xd93   : > { %v2092_v34 = vadd.f32 %v2884_v23, %v3907_v53  ;;  %v2887_v36 = vadd.f32 %v2886_v29, %v2885_v33  ;;  %v2170_v23 = vld [vmem:[%s4134_s9] sm:$0x3] (!%p2780_p1)  ;;  %v3333_v33 = vld [vmem:[%s4135_s10 + $0x8] sm:$0xff] (!%p2780_p1)   ;;  %v3334_v29 = vld [vmem:[%s4135_s10 + $0x10] sm:$0xff] (!%p2780_p1)  }
 0xd95   : > { %v2099_v37 = vadd.f32 %v2098_v32, %v2092_v34  ;;  %v2093_v38 = vadd.f32 %v2887_v36, %v3911_v57  ;;  %v3335_v34 = vld [vmem:[%s4135_s10 + $0x18] sm:$0xff] (!%p2780_p1)   ;;  %v3336_v36 = vld [vmem:[%s4135_s10 + $0x20] sm:$0xff] (!%p2780_p1)  }
 0xd96   : > { %3023 = vmatpush3.bf16.msra.mxu1 (!%p2780_p1), %v3336_v36 }
 0xd97   : > { %2102 = vst.msk [vmem:[#allocation2] sm:$0xff] %vm769_vm1, %v2099_v37  ;;  %v2100_v35 = vadd.f32 %v2098_v32, %v2093_v38  ;;  %v2888_v40 = vpop.f32.mrb[20].mxu0  ;;  %v3337_v37 = vld [vmem:[%s4135_s10 + $0x28] sm:$0xff] (!%p2780_p1)   ;;  %3024 = vmatprep.subr.bf16.mxu1 (!%p2780_p1), %v3456_v62 }
 0xd98   : > { %v2889_v39 = vpop.f32.mrb[21].mxu0 }
 0xd99   : > { %2103 = vst.msk [vmem:[#allocation2 + $0x8] sm:$0xff] %vm769_vm1, %v2100_v35  ;;  %v2890_v8 = vadd.f32 %v2889_v39, %v2888_v40  ;;  %v2891_v42 = vpop.f32.mrb[22].mxu0  ;;  %2108 = sbr.rel (%p2780_p1) target bundleno = 4485 (0x1185), region = 76 }
 0xd9a   : > { %v2892_v43 = vpop.f32.mrb[23].mxu0  ;;  %3025 = vmatpush3.bf16.msra.mxu1 (!%p2780_p1), %v3337_v37  ;;  %v2789_v42 = vld [vmem:[%s4134_s9 + $0x2] sm:$0x3] (!%p2780_p1) }
 0xd9b   : > { %v2094_v1 = vadd.f32 %v2890_v8, %v3909_v56  ;;  %3026 = vmatprep.subr.bf16.mxu1 (!%p2780_p1), %v3456_v62  ;;  %v2804_v43 = vld [vmem:[%s4134_s9 + $0x4] sm:$0x3] (!%p2780_p1) }
 0xd9d   : > { %v2101_v46 = vadd.f32 %v2098_v32, %v2094_v1  ;;  %v3332_v32 = vld [vmem:[%s4135_s10] sm:$0xff] (!%p2780_p1)   ;;  %v3338_v1 = vld [vmem:[%s4135_s10 + $0x30] sm:$0xff] (!%p2780_p1)  }
 0xd9e   : > { %v2111_v53 = vld [vmem:[#allocation2] sm:$0xff] (!%p2780_p1)  ;;  %3027 = vmatpush3.bf16.msra.mxu1 (!%p2780_p1), %v3338_v1 }
 0xd9f   : > { %2104 = vst.msk [vmem:[#allocation2 + $0x10] sm:$0xff] %vm769_vm1, %v2101_v46  ;;  %v2114_v20 = vsel (!%p2780_p1), %vm769_vm1, %v2111_v53, 0.0  ;;  %v3339_v46 = vld [vmem:[%s4135_s10 + $0x38] sm:$0xff] (!%p2780_p1)   ;;  %3028 = vmatprep.subr.bf16.mxu1 (!%p2780_p1), %v3456_v62 }
 0xda0   : > { %v2112_v44 = vld [vmem:[#allocation2 + $0x8] sm:$0xff]  ;;  %2115 = vadd.xlane.f32.xlu0 %v2114_v20 }
 0xda1   : > { %v2117_v45 = vsel %vm769_vm1, %v2112_v44, 0.0 }
 0xda2   : > { %3029 = vmatpush3.bf16.msra.mxu1 %v3339_v46 }
 0xda3   : > { %3042 = vmatprep.subr.bf16.mxu1 %v3456_v62 }
 0xda4   : > { %2118 = vadd.xlane.f32.xlu0 %v2117_v45  ;;  %v3340_v45 = vld [vmem:[%s4135_s10 + $0x40] sm:$0xff]  }
 0xda6   : > { %v2113_v57 = vld [vmem:[#allocation2 + $0x10] sm:$0xff] }
 0xda7   : > { %v2120_v19 = vsel %vm769_vm1, %v2113_v57, 0.0 }
 0xda8   : > { %2121 = vadd.xlane.f32.xlu1 %v2120_v19 }
 0xe2d   : > { %v2116_v18 = vpop.xlane.xlu0 %2115 }
 0xe2e   : > { %v2123_v47 = vmul.f32 0.015625, %v2116_v18 }
 0xe30   : > { %v2126_v49 = vsub.f32 %v2111_v53, %v2123_v47 }
 0xe31   : > { %v2119_v7 = vpop.xlane.xlu0 %2118 }
 0xe32   : > { %v2124_v10 = vmul.f32 0.015625, %v2119_v7  ;;  %v2129_v51 = vmul.f32 %v2126_v49, %v2126_v49 }
 0xe34   : > { %v2127_v54 = vsub.f32 %v2112_v44, %v2124_v10  ;;  %v2132_v55 = vsel %vm769_vm1, %v2129_v51, 0.0 }
 0xe35   : > { %v2122_v56 = vpop.xlane.xlu1 %2121  ;;  %2133 = vadd.xlane.f32.xlu1 %v2132_v55 }
 0xe36   : > { %v2125_v48 = vmul.f32 0.015625, %v2122_v56  ;;  %v2130_v58 = vmul.f32 %v2127_v54, %v2127_v54 }
 0xe38   : > { %v2128_v50 = vsub.f32 %v2113_v57, %v2125_v48  ;;  %v2135_v59 = vsel %vm769_vm1, %v2130_v58, 0.0 }
 0xe39   : > { %2136 = vadd.xlane.f32.xlu0 %v2135_v59 }
 0xe3a   : > { %v2131_v52 = vmul.f32 %v2128_v50, %v2128_v50 }
 0xe3c   : > { %v2138_v61 = vsel %vm769_vm1, %v2131_v52, 0.0 }
 0xe3d   : > { %2139 = vadd.xlane.f32.xlu1 %v2138_v61  ;;  %v2169_v61 = vld [vmem:[%s4170_s26] sm:$0xf] }
 0xec2   : > { %v2134_v60 = vpop.xlane.xlu1 %2133 }
 0xec3   : > { %v2141_v41 = vmul.f32 0.015625, %v2134_v60 }
 0xec5   : > { %v2144_v0 = vadd.f32 1e-06, %v2141_v41 }
 0xec6   : > { %v2137_v3 = vpop.xlane.xlu0 %2136 }
 0xec7   : > { %3344 = vrsqrt.f32 %v2144_v0  ;;  %v2142_v6 = vmul.f32 0.015625, %v2137_v3 }
 0xec9   : > { %v2145_v9 = vadd.f32 1e-06, %v2142_v6 }
 0xeca   : > { %v2140_v2 = vpop.xlane.xlu1 %2139 }
 0xecb   : > { %v2143_v4 = vmul.f32 0.015625, %v2140_v2 }
 0xecd   : > { %v2146_v63 = vadd.f32 1e-06, %v2143_v4 }
 0xecf   : > { %3346 = vrsqrt.f32 %v2146_v63 }
 0xed0   : > { %3348 = vrsqrt.f32 %v2145_v9 }
 0xed1   : > { %v3345_v11 = vpop.eup %3344 }
 0xed2   : > { %v2150_v12 = vmul.f32 %v3345_v11, %v2126_v49  ;;  %v3341_v49 = vld [vmem:[%s4135_s10 + $0x48] sm:$0xff]  }
 0xed4   : > { %v2157_v24 = vmul.f32 %v2781_v14, %v2150_v12 }
 0xed6   : > { %v2164_v30 = vadd.f32 %v2782_v25, %v2157_v24 }
 0xed9   : > { %v3347_v16 = vpop.eup %3346 }
 0xeda   : > { %v3349_v17 = vpop.eup %3348  ;;  %v2152_v21 = vmul.f32 %v3347_v16, %v2128_v50  ;;  %v3342_v50 = vld [vmem:[%s4135_s10 + $0x50] sm:$0xff]  }
 0xedb   : > { %v2151_v22 = vmul.f32 %v3349_v17, %v2127_v54  ;;  %v3343_v54 = vld [vmem:[%s4135_s10 + $0x58] sm:$0xff]  }
 0xedc   : > { %v2159_v26 = vmul.f32 %v2781_v14, %v2152_v21 }
 0xedd   : > { %v2158_v27 = vmul.f32 %v2781_v14, %v2151_v22 }
 0xede   : > { %v2166_v28 = vadd.f32 %v2782_v25, %v2159_v26 }
 0xedf   : > { %v2165_v31 = vadd.f32 %v2782_v25, %v2158_v27 }
 0xee0   : > { %v2168_v5 = vpack.c.bf16 %v2166_v28, %v2166_v28 }
 0xee1   : > { %v2167_v13 = vpack.c.bf16 %v2165_v31, %v2164_v30 }
 0xee2   : > { %v2175_v15 = vsel %vm1044_vm3, %v2168_v5, 0 }
 0xee3   : > { %2995 = vmatpush3.bf16.msra.mxu0 %v2167_v13 }
 0xee4   : > { %2996 = vmatprep.subr.bf16.mxu0 %v3456_v62 }
 0xee7   : > { %2997 = vmatpush3.bf16.msra.mxu0 %v2175_v15 }
 0xee8   : > { %3002 = vmatprep.subr.bf16.mxu0 %v3456_v62 }
 0xeea   : > { %2999 = vmatmul.mubr.msk.bf16.vlgmr.msra.gmra.mrb[0].mxu0 %vm1000_vm5, %v2170_v23 }
 0xeeb   : > { %3003 = vmatpush3.bf16.msra.mxu0 %v3332_v32  ;;  %3010 = vmatprep.mubr.msk.bf16.mxu0 %vm3457_vm8, %v3456_v62 }
 0xeec   : > { %3004 = vmatprep.subr.bf16.mxu0 %v3456_v62 }
 0xeef   : > { %3005 = vmatpush3.bf16.msra.mxu0 %v3333_v33 }
 0xef0   : > { %3006 = vmatprep.subr.bf16.mxu0 %v3456_v62 }
 0xef3   : > { %3007 = vmatpush3.bf16.msra.mxu0 %v3334_v29 }
 0xef4   : > { %3008 = vmatprep.subr.bf16.mxu0 %v3456_v62 }
 0xef7   : > { %3009 = vmatpush3.bf16.msra.mxu0 %v3335_v34 }
 0xef8   : > { %3014 = vmatprep.subr.bf16.mxu0 %v3456_v62 }
 0xfbd   : > { %v2211_v38 = vpop.f32.mrb[0].mxu0 }
 0xfbe   : > { %v2217_v35 = vpack.c.bf16 %v2211_v38, %v2211_v38  ;;  %v3000_v40 = vpop.f32.mrb[1].mxu0 }
 0xfbf   : > { %v2214_v39 = vpop.f32.mrb[2].mxu0 }
 0xfc0   : > { %v3001_v8 = vpop.f32.mrb[3].mxu0  ;;  %3011 = vmatmul.mubr.msk.bf16.vlgmr.msra.gmra.mrb[4].mxu0 %vm769_vm1, %v2217_v35 }
 0xfc1   : > { %3015 = vmatpush3.bf16.msra.mxu0 %v2167_v13  ;;  %3018 = vmatprep.mubr.msk.bf16.mxu0 %vm3457_vm8, %v3456_v62 }
 0xfc2   : > { %3016 = vmatprep.subr.bf16.mxu0 %v3456_v62 }
 0xfc5   : > { %3017 = vmatpush3.bf16.msra.mxu0 %v2175_v15 }
 0xfc6   : > { %3034 = vmatprep.subr.bf16.mxu0 %v3456_v62 }
 0xfc8   : > { %3019 = vmatmul.mubr.msk.bf16.vlgmr.msra.gmra.mrb[8].mxu0 %vm1000_vm5, %v2789_v42 }
 0xfc9   : > { %3035 = vmatpush3.bf16.msra.mxu0 %v2167_v13  ;;  %3038 = vmatprep.mubr.msk.bf16.mxu0 %vm3457_vm8, %v3456_v62 }
 0xfca   : > { %3036 = vmatprep.subr.bf16.mxu0 %v3456_v62 }
 0xfcd   : > { %3037 = vmatpush3.bf16.msra.mxu0 %v2175_v15 }
 0xfd0   : > { %3039 = vmatmul.mubr.msk.bf16.vlgmr.msra.gmra.mrb[12].mxu0 %vm1000_vm5, %v2804_v43 }
0x1093   : > { %v2287_v53 = vpop.f32.mrb[4].mxu0 }
0x1094   : > { %v3012_v57 = vpop.f32.mrb[5].mxu0  ;;  %v2293_v58 = vadd.f32 %v2287_v53, %v2169_v61 }
0x1095   : > { %v2290_v44 = vpop.f32.mrb[6].mxu0 }
0x1096   : > { %v3013_v20 = vpop.f32.mrb[7].mxu0 }
0x109b   : > { %v2333_v19 = vpop.f32.mrb[8].mxu0 }
0x109c   : > { %v2339_v18 = vpack.c.bf16 %v2333_v19, %v2333_v19  ;;  %v3020_v56 = vpop.f32.mrb[9].mxu0 }
0x109d   : > { %v2336_v47 = vpop.f32.mrb[10].mxu0 }
0x109e   : > { %v3021_v48 = vpop.f32.mrb[11].mxu0  ;;  %3031 = vmatmul.mubr.msk.bf16.vlgmr.msra.gmra.mrb[0].mxu1 %vm769_vm1, %v2339_v18 }
0x109f   : > { %3043 = vmatpush3.bf16.msra.mxu1 %v3340_v45  ;;  %3050 = vmatprep.mubr.msk.bf16.mxu1 %vm3457_vm8, %v3456_v62 }
0x10a0   : > { %3044 = vmatprep.subr.bf16.mxu1 %v3456_v62 }
0x10a3   : > { %3045 = vmatpush3.bf16.msra.mxu1 %v3341_v49  ;;  %v2456_v7 = vpop.f32.mrb[12].mxu0 }
0x10a4   : > { %3046 = vmatprep.subr.bf16.mxu1 %v3456_v62  ;;  %v3040_v10 = vpop.f32.mrb[13].mxu0  ;;  %v2462_v55 = vpack.c.bf16 %v2456_v7, %v2456_v7 }
0x10a5   : > { %v2459_v51 = vpop.f32.mrb[14].mxu0 }
0x10a6   : > { %v3041_v52 = vpop.f32.mrb[15].mxu0 }
0x10a7   : > { %3047 = vmatpush3.bf16.msra.mxu1 %v3342_v50 }
0x10a8   : > { %3048 = vmatprep.subr.bf16.mxu1 %v3456_v62 }
0x10ab   : > { %3049 = vmatpush3.bf16.msra.mxu1 %v3343_v54 }
0x10ae   : > { %3051 = vmatmul.mubr.msk.bf16.vlgmr.msra.gmra.mrb[0].mxu1 %vm769_vm1, %v2462_v55 }
0x1181   : > { %v2533_v59 = vpop.f32.mrb[0].mxu1 }
0x1182   : > { %v3079_v60 = vadd.f32 %v2533_v59, %v2293_v58  ;;  %v3052_v41 = vpop.f32.mrb[1].mxu1 }
0x1183   : > { %v2536_v0 = vpop.f32.mrb[2].mxu1 }
0x1184   : > { %2541 = vst.msk [vmem:[%s493_s28] sm:$0xf] %vm2540_vm9, %v3079_v60  ;;  %v3053_v2 = vpop.f32.mrb[3].mxu1 }
0x1185 PF: > { %s4171_s13 = sld [smem:[#allocation9_spill]]  ;;  %s4174_s23 = sld [smem:[#allocation20_spill]] }
0x1186   : > { %s4172_s21 = sld [smem:[#allocation7_spill]]  ;;  %s2556_s11 = sshll.u32 %s493_s28, 4  ;;  %s2557_s11 = int_to_ptr.vmem [resolvable:$true] %s2556_s11 }
0x1187   : > { %s3350_s15 = scalar_lea.vmem %s2557_s11, 64  ;;  %s3458_s12 = smov [#allocation3]  }
0x1188   : > { %p3351_p2 = scmp.ne.s32.totalorder %s2557_s11, %s3350_s15  ;;  %s3354_s19 = sshll.u32 %s3458_s12, 4  ;;  %s3355_s19 = int_to_ptr.vmem [resolvable:$false] %s3354_s19 }
0x1189   : > { %s3356_s0 = scalar_lea.vmem %s3355_s19, 128  ;;  %p3357_p6 = scmp.lt.s32.totalorder %s2557_s11, %s3355_s19 }
0x118a   : > { %p3352_p4 = pnand %p3351_p2, %p3573_p3  ;;  %p3358_p7 = scmp.lt.s32.totalorder %s3356_s0, %s3350_s15 }
0x118b   : > { %s2820_s25 = sshll.u32 %s4171_s13, 6  ;;  %s4175_s16 = smov %s4174_s23 }
0x118c   : > { %s4074_s20 = scalar_lea.hbm %s4174_s23, %s2820_s25  ;;  %s4176_s22 = sand.u32 1, %s4172_s21  }
0x118d   : > { %s2543_s14 = scalar_lea.sflag [#allocation4], %s4176_s22  ;;  %p3353_p5 = pneg %p3352_p4 }
0x118e   : > { %p3359_p8 = por %p3358_p7, %p3357_p6 }
0x1190   : > { %p3360_p10 = pnand %p3359_p8, %p3353_p5 }
0x1192   : > { %3363 = shalt.err (!%p3360_p10)
}
0x1193   : > { %s3364_s29 = scalar_lea.hbm %s4074_s20, 64  ;;  %s3368_s30 = scalar_lea.hbm %s4175_s16, 128 }
0x1194   : > { %p3365_p11 = scmp.ne.s32.totalorder %s4074_s20, %s3364_s29  ;;  %p3369_p0 = scmp.lt.u32.totalorder %s4074_s20, %s4175_s16 }
0x1195   : > { %p3370_p1 = scmp.lt.u32.totalorder %s3368_s30, %s3364_s29  ;;  %p3372_p4 = scmp.lt.u32.totalorder %s3364_s29, %s4074_s20 }
0x1196   : > { %p3366_p12 = pnand %p3365_p11, %p3573_p3 }
0x1197   : > { %p3371_p2 = por %p3370_p1, %p3369_p0 }
0x1198   : > { %p3367_p13 = pneg %p3366_p12 }
0x1199   : > { %p3373_p5 = por %p3372_p4, %p3371_p2 }
0x119b   : > { %p3374_p6 = pnand %p3373_p5, %p3367_p13 }
0x119d   : > { %3377 = shalt.err (!%p3374_p6)
}
0x119e   : > { %3097 = dma.vmem_to_hbm [thread:$0]  (%p3573_p3), %s2557_s11, 64, %s4074_s20, %s2543_s14  }
0x119f PF: > { %s4177_s21 = sld [smem:[#allocation12_spill]]  ;;  %s4178_s25 = sld [smem:[#allocation6_spill]] }
0x11a5   : > { %p3103_p7 = scmp.ge.s32.totalorder %s4177_s21, 2  ;;  %s2568_s17 = sand.u32 1, %s4178_s25  }
0x11a6   : > { %s2569_s23 = scalar_lea.sflag [#allocation4], %s2568_s17 }
0x11a7   : > { %p3100_p8 = pnand %p3103_p7, %p3583_p9 }
0x11a9   : > { %3411 = dma.done.wait (!%p3100_p8), %s2569_s23, 64  }
0x11aa   : > { %3413 = vsyncadd (!%p3100_p8), %s2569_s23, 4294967232  ;;  %s25_s28 = sadd.s32 1, %s4177_s21   ;;  %s4180_s21 = sld [smem:[#allocation7_spill]] }
0x11ab   : > { %p22_p10 = scmp.ge.s32.totalorder %s25_s28, 6   ;;  %s4181_s22 = sld [smem:[#allocation8_spill]] }
0x11ac   : > { %s4182_s23 = sld [smem:[#allocation17_spill]]  ;;  %s4183_s24 = sld [smem:[#allocation10_spill]] }
0x11ad   : > { %s4184_s25 = sld [smem:[#allocation11_spill]]  ;;  %s4185_s26 = sld [smem:[#allocation13_spill]] }
0x11ae   : > { %s4186_s27 = sld [smem:[#allocation15_spill]]  ;;  %24 = sbr.rel (!%p22_p10) target bundleno = 9 (0x9), region = 130 }
0x11b5   :  { %2574 = vsyncpa [#allocation4], 1 }
0x11b6   :  { %2576 = vsyncpa [#allocation4 + $0x1], 1 }

</bundles_post_ra>
